<compile_context>
chip_gen: v5e
topology: v5e:2x2
jax: 0.10.0
libtpu: 0.0.40
codegen_flags: <defaults>
</compile_context>

<pallas_src>
import functools

import jax
import jax.numpy as jnp
from jax import lax
from jax.experimental import pallas as pl
from jax.experimental.pallas import tpu as pltpu


# ---------------------------------------------------------------------------
# Per-timestep LSTM cell math (PyTorch gate order: i, f, g, o).
# xg_t = x_t @ W_ih^T + b_ih + b_hh is precomputed outside the recurrence.
# ---------------------------------------------------------------------------
def _lstm_step(xg_t, h, c, whh, hidden):
    # Only sequentially-dependent matmul: h @ W_hh^T, f32 accumulation.
    gates = xg_t + jnp.dot(h, whh, preferred_element_type=jnp.float32)  # (B,4H)
    # Two full-vreg EUP pushes instead of four 32-lane sub-slice pushes.
    sig = jax.nn.sigmoid(gates)
    tnh = jnp.tanh(gates)
    i_g = sig[:, 0 * hidden:1 * hidden]
    f_g = sig[:, 1 * hidden:2 * hidden]
    g_g = tnh[:, 2 * hidden:3 * hidden]
    o_g = sig[:, 3 * hidden:4 * hidden]
    c_new = f_g * c + i_g * g_g
    h_new = o_g * jnp.tanh(c_new)
    return h_new, c_new


# ---------------------------------------------------------------------------
# Intermediate LSTM layer kernel.
# Emits xg_{l+1}[t] = h_l[t] @ W_ih_{l+1}^T + b_{l+1}  (lane-dense 4H output).
# Grid iterates over time chunks ("arbitrary" = sequential); h/c carried in
# VMEM scratch.  Padded tail timesteps are masked on the carry only.
# ---------------------------------------------------------------------------
def _lstm_mid_kernel(t_real, t_chunk, xg_ref, whh_hbm, wih_next_ref,
                     b_next_ref, out_ref, whh_scr, h_scr, c_scr, sem):
    t = pl.program_id(0)
    hidden = h_scr.shape[-1]
    needs_mask = (t_real % t_chunk) != 0  # static

    @pl.when(t == 0)
    def _init():
        cp = pltpu.make_async_copy(whh_hbm, whh_scr, sem)
        cp.start()                               # hide W_hh fetch behind init
        h_scr[...] = jnp.zeros_like(h_scr)
        c_scr[...] = jnp.zeros_like(c_scr)
        cp.wait()

    whh = whh_scr[...]            # (H, 4H)   single-buffered, VMEM resident
    wih_next = wih_next_ref[...]  # (H, 4H_next)
    b_next = b_next_ref[...]      # (1, 4H_next)

    h = h_scr[...]
    c = c_scr[...]
    for tt in range(t_chunk):     # static unroll
        h_new, c_new = _lstm_step(xg_ref[tt], h, c, whh, hidden)
        if needs_mask:
            pred = (t * t_chunk + tt) < t_real
            h = jnp.where(pred, h_new, h)
            c = jnp.where(pred, c_new, c)
        else:
            h, c = h_new, c_new
        # Fused next-layer input projection: (B, 4H_next) lane-dense store,
        # hidden sequence never hits HBM.
        out_ref[tt] = (jnp.dot(h, wih_next, preferred_element_type=jnp.float32)
                       + b_next)
    h_scr[...] = h
    c_scr[...] = c


# ---------------------------------------------------------------------------
# Top LSTM layer kernel with the fc head fused into the final grid step.
# ---------------------------------------------------------------------------
def _lstm_last_fc_kernel(t_real, t_chunk, xg_ref, whh_hbm, wfc_ref, bfc_ref,
                         out_ref, whh_scr, h_scr, c_scr, sem):
    t = pl.program_id(0)
    hidden = h_scr.shape[-1]
    needs_mask = (t_real % t_chunk) != 0  # static

    @pl.when(t == 0)
    def _init():
        cp = pltpu.make_async_copy(whh_hbm, whh_scr, sem)
        cp.start()
        h_scr[...] = jnp.zeros_like(h_scr)
        c_scr[...] = jnp.zeros_like(c_scr)
        out_ref[...] = jnp.zeros_like(out_ref)   # robustness (revisited block)
        cp.wait()

    whh = whh_scr[...]

    h = h_scr[...]
    c = c_scr[...]
    for tt in range(t_chunk):
        h_new, c_new = _lstm_step(xg_ref[tt], h, c, whh, hidden)
        if needs_mask:
            pred = (t * t_chunk + tt) < t_real
            h = jnp.where(pred, h_new, h)
            c = jnp.where(pred, c_new, c)
        else:
            h, c = h_new, c_new
    h_scr[...] = h
    c_scr[...] = c

    @pl.when(t == pl.num_programs(0) - 1)
    def _fc():
        out_ref[...] = (jnp.dot(h, wfc_ref[...],
                                preferred_element_type=jnp.float32)
                        + bfc_ref[...])


# ---------------------------------------------------------------------------
# pallas_call wrappers
# ---------------------------------------------------------------------------
def lstm_mid_layer(xg, whh_t, wih_next_t, b_next, t_chunk, t_real):
    """xg: (T_pad, B, 4H) f32 -> xg_next: (T_pad, B, 4H_next) f32."""
    Tp, B, G = xg.shape
    H = whh_t.shape[0]
    Gn = wih_next_t.shape[1]
    kernel = functools.partial(_lstm_mid_kernel, t_real, t_chunk)
    return pl.pallas_call(
        kernel,
        out_shape=jax.ShapeDtypeStruct((Tp, B, Gn), jnp.float32),
        grid_spec=pltpu.PrefetchScalarGridSpec(
            num_scalar_prefetch=0,
            grid=(Tp // t_chunk,),
            in_specs=[
                pl.BlockSpec((t_chunk, B, G), lambda t: (t, 0, 0)),
                pl.BlockSpec(memory_space=pl.ANY),       # W_hh^T: manual DMA
                pl.BlockSpec((H, Gn), lambda t: (0, 0)),  # W_ih_{l+1}^T
                pl.BlockSpec((1, Gn), lambda t: (0, 0)),  # b_{l+1}
            ],
            out_specs=pl.BlockSpec((t_chunk, B, Gn), lambda t: (t, 0, 0)),
            scratch_shapes=[
                pltpu.VMEM((H, G), jnp.float32),   # single-buffered W_hh^T
                pltpu.VMEM((B, H), jnp.float32),   # h carry
                pltpu.VMEM((B, H), jnp.float32),   # c carry
                pltpu.SemaphoreType.DMA,
            ],
        ),
        compiler_params=pltpu.CompilerParams(
            dimension_semantics=("arbitrary",)),   # time is sequential
    )(xg, whh_t, wih_next_t, b_next)


def lstm_last_layer_fc(xg, whh_t, wfc_t, bfc, t_chunk, t_real):
    """Top LSTM layer + fused fc on the last real hidden state -> (B, O)."""
    Tp, B, G = xg.shape
    H = whh_t.shape[0]
    O = wfc_t.shape[1]
    kernel = functools.partial(_lstm_last_fc_kernel, t_real, t_chunk)
    return pl.pallas_call(
        kernel,
        out_shape=jax.ShapeDtypeStruct((B, O), jnp.float32),
        grid_spec=pltpu.PrefetchScalarGridSpec(
            num_scalar_prefetch=0,
            grid=(Tp // t_chunk,),
            in_specs=[
                pl.BlockSpec((t_chunk, B, G), lambda t: (t, 0, 0)),
                pl.BlockSpec(memory_space=pl.ANY),
                pl.BlockSpec((H, O), lambda t: (0, 0)),
                pl.BlockSpec((1, O), lambda t: (0, 0)),
            ],
            out_specs=pl.BlockSpec((B, O), lambda t: (0, 0)),  # VMEM resident
            scratch_shapes=[
                pltpu.VMEM((H, G), jnp.float32),
                pltpu.VMEM((B, H), jnp.float32),
                pltpu.VMEM((B, H), jnp.float32),
                pltpu.SemaphoreType.DMA,
            ],
        ),
        compiler_params=pltpu.CompilerParams(
            dimension_semantics=("arbitrary",)),
    )(xg, whh_t, wfc_t, bfc)


# ---------------------------------------------------------------------------
# Full model forward
# ---------------------------------------------------------------------------
def _round_up(x, m):
    return (x + m - 1) // m * m


def _pick_t_chunk(T, B, G, target=32, vmem_budget=16 * 1024 * 1024):
    """Chunk of timesteps per grid step, sized against a conservative VMEM
    budget (double-buffered f32 xg in + xg_next out) so the same code fits
    v5e/v6e (128 MiB) and v7x (64 MiB) scoped VMEM."""
    per_t = 4 * B * G * 4
    cap = max(1, vmem_budget // max(per_t, 1))
    return max(1, min(T, target, cap))


def init_params(key, input_dim, hidden_dim, num_layers, output_dim):
    """PyTorch-style uniform(-k, k) init, k = 1/sqrt(hidden).  All f32."""
    k = 1.0 / float(hidden_dim) ** 0.5
    params = {"lstm": [], "fc": None}
    for layer in range(num_layers):
        d_in = input_dim if layer == 0 else hidden_dim
        key, k1, k2, k3, k4 = jax.random.split(key, 5)
        w_ih = jax.random.uniform(k1, (4 * hidden_dim, d_in), jnp.float32, -k, k)
        w_hh = jax.random.uniform(k2, (4 * hidden_dim, hidden_dim), jnp.float32, -k, k)
        b_ih = jax.random.uniform(k3, (4 * hidden_dim,), jnp.float32, -k, k)
        b_hh = jax.random.uniform(k4, (4 * hidden_dim,), jnp.float32, -k, k)
        params["lstm"].append({
            "wih_t": w_ih.T,                                     # (D_in, 4H)
            "whh_t": w_hh.T,                                     # (H, 4H)
            "b": (b_ih + b_hh).reshape(1, 4 * hidden_dim),       # (1, 4H)
        })
    key, k5, k6 = jax.random.split(key, 3)
    w_fc = jax.random.uniform(k5, (output_dim, hidden_dim), jnp.float32, -k, k)
    b_fc = jax.random.uniform(k6, (output_dim,), jnp.float32, -k, k)
    params["fc"] = {"w_t": w_fc.T,                               # (H, O)
                    "b": b_fc.reshape(1, output_dim)}            # (1, O)
    return params


@jax.jit
def my_model_forward(x_btd, params):
    """x_btd: (B, T, D) batch-first (PyTorch batch_first=True), zero h0/c0."""
    x = x_btd.astype(jnp.float32)
    B, T, D = x.shape
    H = params["lstm"][0]["whh_t"].shape[0]
    G = 4 * H
    n_layers = len(params["lstm"])

    B_pad = _round_up(B, 8)                 # f32 sublane tile: unmasked stores
    t_chunk = _pick_t_chunk(T, B_pad, G)
    T_pad = _round_up(T, t_chunk)           # tail masked on the h/c carry

    x_p = jnp.pad(x, ((0, B_pad - B), (0, T_pad - T), (0, 0)))

    # Layer-0 input projection for ALL timesteps: one big MXU matmul; the
    # batch-first -> time-major transpose is folded into its output layout.
    lp0 = params["lstm"][0]
    xg = jnp.einsum("btd,dg->tbg", x_p, lp0["wih_t"],
                    preferred_element_type=jnp.float32) + lp0["b"]

    for li in range(n_layers - 1):
        lp_next = params["lstm"][li + 1]
        # Next layer's W_ih projection is fused into this layer's recurrence.
        xg = lstm_mid_layer(xg, params["lstm"][li]["whh_t"],
                            lp_next["wih_t"], lp_next["b"], t_chunk, T)
        # TODO(synk): nn.LSTM inter-layer dropout (p=0.01) is train-time only;
        # inference semantics (identity) are used here.

    out_pad = lstm_last_layer_fc(xg, params["lstm"][-1]["whh_t"],
                                 params["fc"]["w_t"], params["fc"]["b"],
                                 t_chunk, T)
    return out_pad[:B]


# ---------------------------------------------------------------------------
# Pure-JAX reference (for a sanity check only)
# ---------------------------------------------------------------------------
def _reference_forward(x, params):
    B = x.shape[0]
    seq = x.astype(jnp.float32)
    for lp in params["lstm"]:
        wih_t, whh_t, b = lp["wih_t"], lp["whh_t"], lp["b"]
        H = whh_t.shape[0]

        def step(carry, x_t, wih_t=wih_t, whh_t=whh_t, b=b, H=H):
            h, c = carry
            gates = x_t @ wih_t + h @ whh_t + b
            i = jax.nn.sigmoid(gates[:, :H])
            f = jax.nn.sigmoid(gates[:, H:2 * H])
            g = jnp.tanh(gates[:, 2 * H:3 * H])
            o = jax.nn.sigmoid(gates[:, 3 * H:])
            c = f * c + i * g
            h = o * jnp.tanh(c)
            return (h, c), h

        h0 = jnp.zeros((B, H), jnp.float32)
        c0 = jnp.zeros((B, H), jnp.float32)
        (_, _), hs = lax.scan(step, (h0, c0), jnp.swapaxes(seq, 0, 1))
        seq = jnp.swapaxes(hs, 0, 1)
    return seq[:, -1, :] @ params["fc"]["w_t"] + params["fc"]["b"]


if __name__ == "__main__":
    input_dim, hidden_dim, num_layers, output_dim = 16, 32, 2, 4
    batch, seq_len = 2, 8

    key = jax.random.PRNGKey(0)
    key_x, key_p = jax.random.split(key)
    x = jax.random.normal(key_x, (batch, seq_len, input_dim), jnp.float32)
    params = init_params(key_p, input_dim, hidden_dim, num_layers, output_dim)

    out = my_model_forward(x, params)
    jax.block_until_ready(out)
    assert out.shape == (batch, output_dim), out.shape

    ref = _reference_forward(x, params)
    assert jnp.allclose(out, ref, atol=2e-2, rtol=2e-2), (
        float(jnp.max(jnp.abs(out - ref))))

    print("KERNEL_OK")
</pallas_src>

<mosaic_0001>
module attributes {stable_mosaic.version = 11 : i64} {
  func.func @_lstm_mid_kernel(%arg0: i32, %arg1: memref<8x8x128xf32, #tpu.memory_space<vmem>>, %arg2: memref<32x128xf32, #tpu.memory_space<any>>, %arg3: memref<32x128xf32, #tpu.memory_space<vmem>>, %arg4: memref<1x128xf32, #tpu.memory_space<vmem>>, %arg5: memref<8x8x128xf32, #tpu.memory_space<vmem>>, %arg6: memref<32x128xf32, #tpu.memory_space<vmem>>, %arg7: memref<8x32xf32, #tpu.memory_space<vmem>>, %arg8: memref<8x32xf32, #tpu.memory_space<vmem>>, %arg9: memref<!tpu.dma_semaphore, #tpu.memory_space<semaphore_mem>>) attributes {dimension_semantics = [#tpu.dimension_semantics<arbitrary>], iteration_bounds = array<i64: 1>, scalar_prefetch = 0 : i64, scratch_operands = 4 : i64, tpu.core_type = #tpu.core_type<tc>, window_params = [{transform_indices = @transform_0, window_bounds = array<i64: 8, 8, 128>}, {}, {pipeline_mode = #tpu.pipeline_mode<synchronous>, transform_indices = @transform_2, window_bounds = array<i64: 32, 128>}, {pipeline_mode = #tpu.pipeline_mode<synchronous>, transform_indices = @transform_3, window_bounds = array<i64: 1, 128>}, {transform_indices = @transform_4, window_bounds = array<i64: 8, 8, 128>}]} {
    %c0_i32 = arith.constant 0 : i32
    %0 = arith.cmpi eq, %arg0, %c0_i32 : i32
    %1 = arith.extui %0 : i1 to i32
    %c0_i32_0 = arith.constant 0 : i32
    %2 = arith.cmpi ne, %1, %c0_i32_0 : i32
    scf.if %2 {
      tpu.enqueue_dma source(%arg2 : memref<32x128xf32, #tpu.memory_space<any>>) target(%arg6 : memref<32x128xf32, #tpu.memory_space<vmem>>) target_semaphore(%arg9 : memref<!tpu.dma_semaphore, #tpu.memory_space<semaphore_mem>>)
      %cst_78 = arith.constant 0.000000e+00 : f32
      %210 = vector.broadcast %cst_78 : f32 to vector<8x32xf32>
      %c0_79 = arith.constant 0 : index
      %c0_80 = arith.constant 0 : index
      %211 = vector.load %arg7[%c0_79, %c0_80] : memref<8x32xf32, #tpu.memory_space<vmem>>, vector<8x32xf32>
      tpu.vector_store %arg7[%c0_79, %c0_80], %210 {strides = array<i32>} : memref<8x32xf32, #tpu.memory_space<vmem>>, vector<8x32xf32>,
      %cst_81 = arith.constant 0.000000e+00 : f32
      %212 = vector.broadcast %cst_81 : f32 to vector<8x32xf32>
      %c0_82 = arith.constant 0 : index
      %c0_83 = arith.constant 0 : index
      %213 = vector.load %arg8[%c0_82, %c0_83] : memref<8x32xf32, #tpu.memory_space<vmem>>, vector<8x32xf32>
      tpu.vector_store %arg8[%c0_82, %c0_83], %212 {strides = array<i32>} : memref<8x32xf32, #tpu.memory_space<vmem>>, vector<8x32xf32>,
      tpu.wait_dma2 semaphore(%arg9 : memref<!tpu.dma_semaphore, #tpu.memory_space<semaphore_mem>>) src(%arg2 : memref<32x128xf32, #tpu.memory_space<any>>) dst(%arg6 : memref<32x128xf32, #tpu.memory_space<vmem>>)
    } else {
    }
    %c0 = arith.constant 0 : index
    %c0_1 = arith.constant 0 : index
    %3 = vector.load %arg6[%c0, %c0_1] : memref<32x128xf32, #tpu.memory_space<vmem>>, vector<32x128xf32>
    %c0_2 = arith.constant 0 : index
    %c0_3 = arith.constant 0 : index
    %4 = vector.load %arg3[%c0_2, %c0_3] : memref<32x128xf32, #tpu.memory_space<vmem>>, vector<32x128xf32>
    %c0_4 = arith.constant 0 : index
    %c0_5 = arith.constant 0 : index
    %5 = vector.load %arg4[%c0_4, %c0_5] : memref<1x128xf32, #tpu.memory_space<vmem>>, vector<1x128xf32>
    %c0_6 = arith.constant 0 : index
    %c0_7 = arith.constant 0 : index
    %6 = vector.load %arg7[%c0_6, %c0_7] : memref<8x32xf32, #tpu.memory_space<vmem>>, vector<8x32xf32>
    %c0_8 = arith.constant 0 : index
    %c0_9 = arith.constant 0 : index
    %7 = vector.load %arg8[%c0_8, %c0_9] : memref<8x32xf32, #tpu.memory_space<vmem>>, vector<8x32xf32>
    %c0_10 = arith.constant 0 : index
    %c0_11 = arith.constant 0 : index
    %c0_12 = arith.constant 0 : index
    %8 = vector.load %arg1[%c0_10, %c0_11, %c0_12] : memref<8x8x128xf32, #tpu.memory_space<vmem>>, vector<1x8x128xf32>
    %9 = vector.shape_cast %8 : vector<1x8x128xf32> to vector<8x128xf32>
    %cst = arith.constant dense<0.000000e+00> : vector<8x128xf32>
    %10 = tpu.matmul %6, %3, %cst {dimension_numbers = #tpu.dot_dimension_numbers<[1], [0], [0], [1], [0, 0, 1, 1], [], []>} : vector<8x32xf32>, vector<32x128xf32>, vector<8x128xf32> -> vector<8x128xf32>
    %11 = arith.addf %9, %10 : vector<8x128xf32>
    %12 = arith.negf %11 : vector<8x128xf32>
    %13 = math.exp %12 : vector<8x128xf32>
    %cst_13 = arith.constant 1.000000e+00 : f32
    %14 = vector.broadcast %cst_13 : f32 to vector<8x128xf32>
    %15 = arith.addf %14, %13 : vector<8x128xf32>
    %16 = arith.divf %14, %15 : vector<8x128xf32>
    %17 = math.tanh %11 : vector<8x128xf32>
    %18 = vector.extract_strided_slice %16 {offsets = [0, 0], sizes = [8, 32], strides = [1, 1]} : vector<8x128xf32> to vector<8x32xf32>
    %19 = vector.extract_strided_slice %16 {offsets = [0, 32], sizes = [8, 32], strides = [1, 1]} : vector<8x128xf32> to vector<8x32xf32>
    %20 = vector.extract_strided_slice %17 {offsets = [0, 64], sizes = [8, 32], strides = [1, 1]} : vector<8x128xf32> to vector<8x32xf32>
    %21 = vector.extract_strided_slice %16 {offsets = [0, 96], sizes = [8, 32], strides = [1, 1]} : vector<8x128xf32> to vector<8x32xf32>
    %22 = arith.mulf %19, %7 : vector<8x32xf32>
    %23 = arith.mulf %18, %20 : vector<8x32xf32>
    %24 = arith.addf %22, %23 : vector<8x32xf32>
    %25 = math.tanh %24 : vector<8x32xf32>
    %26 = arith.mulf %21, %25 : vector<8x32xf32>
    %cst_14 = arith.constant dense<0.000000e+00> : vector<8x128xf32>
    %27 = tpu.matmul %26, %4, %cst_14 {dimension_numbers = #tpu.dot_dimension_numbers<[1], [0], [0], [1], [0, 0, 1, 1], [], []>} : vector<8x32xf32>, vector<32x128xf32>, vector<8x128xf32> -> vector<8x128xf32>
    %28 = vector.broadcast %5 : vector<1x128xf32> to vector<8x128xf32>
    %29 = arith.addf %27, %28 : vector<8x128xf32>
    %c0_15 = arith.constant 0 : index
    %c0_16 = arith.constant 0 : index
    %c0_17 = arith.constant 0 : index
    %30 = vector.load %arg5[%c0_15, %c0_16, %c0_17] : memref<8x8x128xf32, #tpu.memory_space<vmem>>, vector<1x8x128xf32>
    %31 = vector.shape_cast %30 : vector<1x8x128xf32> to vector<8x128xf32>
    %32 = vector.shape_cast %29 : vector<8x128xf32> to vector<1x8x128xf32>
    tpu.vector_store %arg5[%c0_15, %c0_16, %c0_17], %32 {strides = array<i32>} : memref<8x8x128xf32, #tpu.memory_space<vmem>>, vector<1x8x128xf32>,
    %c1 = arith.constant 1 : index
    %c0_18 = arith.constant 0 : index
    %c0_19 = arith.constant 0 : index
    %33 = vector.load %arg1[%c1, %c0_18, %c0_19] : memref<8x8x128xf32, #tpu.memory_space<vmem>>, vector<1x8x128xf32>
    %34 = vector.shape_cast %33 : vector<1x8x128xf32> to vector<8x128xf32>
    %cst_20 = arith.constant dense<0.000000e+00> : vector<8x128xf32>
    %35 = tpu.matmul %26, %3, %cst_20 {dimension_numbers = #tpu.dot_dimension_numbers<[1], [0], [0], [1], [0, 0, 1, 1], [], []>} : vector<8x32xf32>, vector<32x128xf32>, vector<8x128xf32> -> vector<8x128xf32>
    %36 = arith.addf %34, %35 : vector<8x128xf32>
    %37 = arith.negf %36 : vector<8x128xf32>
    %38 = math.exp %37 : vector<8x128xf32>
    %cst_21 = arith.constant 1.000000e+00 : f32
    %39 = vector.broadcast %cst_21 : f32 to vector<8x128xf32>
    %40 = arith.addf %39, %38 : vector<8x128xf32>
    %41 = arith.divf %39, %40 : vector<8x128xf32>
    %42 = math.tanh %36 : vector<8x128xf32>
    %43 = vector.extract_strided_slice %41 {offsets = [0, 0], sizes = [8, 32], strides = [1, 1]} : vector<8x128xf32> to vector<8x32xf32>
    %44 = vector.extract_strided_slice %41 {offsets = [0, 32], sizes = [8, 32], strides = [1, 1]} : vector<8x128xf32> to vector<8x32xf32>
    %45 = vector.extract_strided_slice %42 {offsets = [0, 64], sizes = [8, 32], strides = [1, 1]} : vector<8x128xf32> to vector<8x32xf32>
    %46 = vector.extract_strided_slice %41 {offsets = [0, 96], sizes = [8, 32], strides = [1, 1]} : vector<8x128xf32> to vector<8x32xf32>
    %47 = arith.mulf %44, %24 : vector<8x32xf32>
    %48 = arith.mulf %43, %45 : vector<8x32xf32>
    %49 = arith.addf %47, %48 : vector<8x32xf32>
    %50 = math.tanh %49 : vector<8x32xf32>
    %51 = arith.mulf %46, %50 : vector<8x32xf32>
    %cst_22 = arith.constant dense<0.000000e+00> : vector<8x128xf32>
    %52 = tpu.matmul %51, %4, %cst_22 {dimension_numbers = #tpu.dot_dimension_numbers<[1], [0], [0], [1], [0, 0, 1, 1], [], []>} : vector<8x32xf32>, vector<32x128xf32>, vector<8x128xf32> -> vector<8x128xf32>
    %53 = vector.broadcast %5 : vector<1x128xf32> to vector<8x128xf32>
    %54 = arith.addf %52, %53 : vector<8x128xf32>
    %c1_23 = arith.constant 1 : index
    %c0_24 = arith.constant 0 : index
    %c0_25 = arith.constant 0 : index
    %55 = vector.load %arg5[%c1_23, %c0_24, %c0_25] : memref<8x8x128xf32, #tpu.memory_space<vmem>>, vector<1x8x128xf32>
    %56 = vector.shape_cast %55 : vector<1x8x128xf32> to vector<8x128xf32>
    %57 = vector.shape_cast %54 : vector<8x128xf32> to vector<1x8x128xf32>
    tpu.vector_store %arg5[%c1_23, %c0_24, %c0_25], %57 {strides = array<i32>} : memref<8x8x128xf32, #tpu.memory_space<vmem>>, vector<1x8x128xf32>,
    %c2 = arith.constant 2 : index
    %c0_26 = arith.constant 0 : index
    %c0_27 = arith.constant 0 : index
    %58 = vector.load %arg1[%c2, %c0_26, %c0_27] : memref<8x8x128xf32, #tpu.memory_space<vmem>>, vector<1x8x128xf32>
    %59 = vector.shape_cast %58 : vector<1x8x128xf32> to vector<8x128xf32>
    %cst_28 = arith.constant dense<0.000000e+00> : vector<8x128xf32>
    %60 = tpu.matmul %51, %3, %cst_28 {dimension_numbers = #tpu.dot_dimension_numbers<[1], [0], [0], [1], [0, 0, 1, 1], [], []>} : vector<8x32xf32>, vector<32x128xf32>, vector<8x128xf32> -> vector<8x128xf32>
    %61 = arith.addf %59, %60 : vector<8x128xf32>
    %62 = arith.negf %61 : vector<8x128xf32>
    %63 = math.exp %62 : vector<8x128xf32>
    %cst_29 = arith.constant 1.000000e+00 : f32
    %64 = vector.broadcast %cst_29 : f32 to vector<8x128xf32>
    %65 = arith.addf %64, %63 : vector<8x128xf32>
    %66 = arith.divf %64, %65 : vector<8x128xf32>
    %67 = math.tanh %61 : vector<8x128xf32>
    %68 = vector.extract_strided_slice %66 {offsets = [0, 0], sizes = [8, 32], strides = [1, 1]} : vector<8x128xf32> to vector<8x32xf32>
    %69 = vector.extract_strided_slice %66 {offsets = [0, 32], sizes = [8, 32], strides = [1, 1]} : vector<8x128xf32> to vector<8x32xf32>
    %70 = vector.extract_strided_slice %67 {offsets = [0, 64], sizes = [8, 32], strides = [1, 1]} : vector<8x128xf32> to vector<8x32xf32>
    %71 = vector.extract_strided_slice %66 {offsets = [0, 96], sizes = [8, 32], strides = [1, 1]} : vector<8x128xf32> to vector<8x32xf32>
    %72 = arith.mulf %69, %49 : vector<8x32xf32>
    %73 = arith.mulf %68, %70 : vector<8x32xf32>
    %74 = arith.addf %72, %73 : vector<8x32xf32>
    %75 = math.tanh %74 : vector<8x32xf32>
    %76 = arith.mulf %71, %75 : vector<8x32xf32>
    %cst_30 = arith.constant dense<0.000000e+00> : vector<8x128xf32>
    %77 = tpu.matmul %76, %4, %cst_30 {dimension_numbers = #tpu.dot_dimension_numbers<[1], [0], [0], [1], [0, 0, 1, 1], [], []>} : vector<8x32xf32>, vector<32x128xf32>, vector<8x128xf32> -> vector<8x128xf32>
    %78 = vector.broadcast %5 : vector<1x128xf32> to vector<8x128xf32>
    %79 = arith.addf %77, %78 : vector<8x128xf32>
    %c2_31 = arith.constant 2 : index
    %c0_32 = arith.constant 0 : index
    %c0_33 = arith.constant 0 : index
    %80 = vector.load %arg5[%c2_31, %c0_32, %c0_33] : memref<8x8x128xf32, #tpu.memory_space<vmem>>, vector<1x8x128xf32>
    %81 = vector.shape_cast %80 : vector<1x8x128xf32> to vector<8x128xf32>
    %82 = vector.shape_cast %79 : vector<8x128xf32> to vector<1x8x128xf32>
    tpu.vector_store %arg5[%c2_31, %c0_32, %c0_33], %82 {strides = array<i32>} : memref<8x8x128xf32, #tpu.memory_space<vmem>>, vector<1x8x128xf32>,
    %c3 = arith.constant 3 : index
    %c0_34 = arith.constant 0 : index
    %c0_35 = arith.constant 0 : index
    %83 = vector.load %arg1[%c3, %c0_34, %c0_35] : memref<8x8x128xf32, #tpu.memory_space<vmem>>, vector<1x8x128xf32>
    %84 = vector.shape_cast %83 : vector<1x8x128xf32> to vector<8x128xf32>
    %cst_36 = arith.constant dense<0.000000e+00> : vector<8x128xf32>
    %85 = tpu.matmul %76, %3, %cst_36 {dimension_numbers = #tpu.dot_dimension_numbers<[1], [0], [0], [1], [0, 0, 1, 1], [], []>} : vector<8x32xf32>, vector<32x128xf32>, vector<8x128xf32> -> vector<8x128xf32>
    %86 = arith.addf %84, %85 : vector<8x128xf32>
    %87 = arith.negf %86 : vector<8x128xf32>
    %88 = math.exp %87 : vector<8x128xf32>
    %cst_37 = arith.constant 1.000000e+00 : f32
    %89 = vector.broadcast %cst_37 : f32 to vector<8x128xf32>
    %90 = arith.addf %89, %88 : vector<8x128xf32>
    %91 = arith.divf %89, %90 : vector<8x128xf32>
    %92 = math.tanh %86 : vector<8x128xf32>
    %93 = vector.extract_strided_slice %91 {offsets = [0, 0], sizes = [8, 32], strides = [1, 1]} : vector<8x128xf32> to vector<8x32xf32>
    %94 = vector.extract_strided_slice %91 {offsets = [0, 32], sizes = [8, 32], strides = [1, 1]} : vector<8x128xf32> to vector<8x32xf32>
    %95 = vector.extract_strided_slice %92 {offsets = [0, 64], sizes = [8, 32], strides = [1, 1]} : vector<8x128xf32> to vector<8x32xf32>
    %96 = vector.extract_strided_slice %91 {offsets = [0, 96], sizes = [8, 32], strides = [1, 1]} : vector<8x128xf32> to vector<8x32xf32>
    %97 = arith.mulf %94, %74 : vector<8x32xf32>
    %98 = arith.mulf %93, %95 : vector<8x32xf32>
    %99 = arith.addf %97, %98 : vector<8x32xf32>
    %100 = math.tanh %99 : vector<8x32xf32>
    %101 = arith.mulf %96, %100 : vector<8x32xf32>
    %cst_38 = arith.constant dense<0.000000e+00> : vector<8x128xf32>
    %102 = tpu.matmul %101, %4, %cst_38 {dimension_numbers = #tpu.dot_dimension_numbers<[1], [0], [0], [1], [0, 0, 1, 1], [], []>} : vector<8x32xf32>, vector<32x128xf32>, vector<8x128xf32> -> vector<8x128xf32>
    %103 = vector.broadcast %5 : vector<1x128xf32> to vector<8x128xf32>
    %104 = arith.addf %102, %103 : vector<8x128xf32>
    %c3_39 = arith.constant 3 : index
    %c0_40 = arith.constant 0 : index
    %c0_41 = arith.constant 0 : index
    %105 = vector.load %arg5[%c3_39, %c0_40, %c0_41] : memref<8x8x128xf32, #tpu.memory_space<vmem>>, vector<1x8x128xf32>
    %106 = vector.shape_cast %105 : vector<1x8x128xf32> to vector<8x128xf32>
    %107 = vector.shape_cast %104 : vector<8x128xf32> to vector<1x8x128xf32>
    tpu.vector_store %arg5[%c3_39, %c0_40, %c0_41], %107 {strides = array<i32>} : memref<8x8x128xf32, #tpu.memory_space<vmem>>, vector<1x8x128xf32>,
    %c4 = arith.constant 4 : index
    %c0_42 = arith.constant 0 : index
    %c0_43 = arith.constant 0 : index
    %108 = vector.load %arg1[%c4, %c0_42, %c0_43] : memref<8x8x128xf32, #tpu.memory_space<vmem>>, vector<1x8x128xf32>
    %109 = vector.shape_cast %108 : vector<1x8x128xf32> to vector<8x128xf32>
    %cst_44 = arith.constant dense<0.000000e+00> : vector<8x128xf32>
    %110 = tpu.matmul %101, %3, %cst_44 {dimension_numbers = #tpu.dot_dimension_numbers<[1], [0], [0], [1], [0, 0, 1, 1], [], []>} : vector<8x32xf32>, vector<32x128xf32>, vector<8x128xf32> -> vector<8x128xf32>
    %111 = arith.addf %109, %110 : vector<8x128xf32>
    %112 = arith.negf %111 : vector<8x128xf32>
    %113 = math.exp %112 : vector<8x128xf32>
    %cst_45 = arith.constant 1.000000e+00 : f32
    %114 = vector.broadcast %cst_45 : f32 to vector<8x128xf32>
    %115 = arith.addf %114, %113 : vector<8x128xf32>
    %116 = arith.divf %114, %115 : vector<8x128xf32>
    %117 = math.tanh %111 : vector<8x128xf32>
    %118 = vector.extract_strided_slice %116 {offsets = [0, 0], sizes = [8, 32], strides = [1, 1]} : vector<8x128xf32> to vector<8x32xf32>
    %119 = vector.extract_strided_slice %116 {offsets = [0, 32], sizes = [8, 32], strides = [1, 1]} : vector<8x128xf32> to vector<8x32xf32>
    %120 = vector.extract_strided_slice %117 {offsets = [0, 64], sizes = [8, 32], strides = [1, 1]} : vector<8x128xf32> to vector<8x32xf32>
    %121 = vector.extract_strided_slice %116 {offsets = [0, 96], sizes = [8, 32], strides = [1, 1]} : vector<8x128xf32> to vector<8x32xf32>
    %122 = arith.mulf %119, %99 : vector<8x32xf32>
    %123 = arith.mulf %118, %120 : vector<8x32xf32>
    %124 = arith.addf %122, %123 : vector<8x32xf32>
    %125 = math.tanh %124 : vector<8x32xf32>
    %126 = arith.mulf %121, %125 : vector<8x32xf32>
    %cst_46 = arith.constant dense<0.000000e+00> : vector<8x128xf32>
    %127 = tpu.matmul %126, %4, %cst_46 {dimension_numbers = #tpu.dot_dimension_numbers<[1], [0], [0], [1], [0, 0, 1, 1], [], []>} : vector<8x32xf32>, vector<32x128xf32>, vector<8x128xf32> -> vector<8x128xf32>
    %128 = vector.broadcast %5 : vector<1x128xf32> to vector<8x128xf32>
    %129 = arith.addf %127, %128 : vector<8x128xf32>
    %c4_47 = arith.constant 4 : index
    %c0_48 = arith.constant 0 : index
    %c0_49 = arith.constant 0 : index
    %130 = vector.load %arg5[%c4_47, %c0_48, %c0_49] : memref<8x8x128xf32, #tpu.memory_space<vmem>>, vector<1x8x128xf32>
    %131 = vector.shape_cast %130 : vector<1x8x128xf32> to vector<8x128xf32>
    %132 = vector.shape_cast %129 : vector<8x128xf32> to vector<1x8x128xf32>
    tpu.vector_store %arg5[%c4_47, %c0_48, %c0_49], %132 {strides = array<i32>} : memref<8x8x128xf32, #tpu.memory_space<vmem>>, vector<1x8x128xf32>,
    %c5 = arith.constant 5 : index
    %c0_50 = arith.constant 0 : index
    %c0_51 = arith.constant 0 : index
    %133 = vector.load %arg1[%c5, %c0_50, %c0_51] : memref<8x8x128xf32, #tpu.memory_space<vmem>>, vector<1x8x128xf32>
    %134 = vector.shape_cast %133 : vector<1x8x128xf32> to vector<8x128xf32>
    %cst_52 = arith.constant dense<0.000000e+00> : vector<8x128xf32>
    %135 = tpu.matmul %126, %3, %cst_52 {dimension_numbers = #tpu.dot_dimension_numbers<[1], [0], [0], [1], [0, 0, 1, 1], [], []>} : vector<8x32xf32>, vector<32x128xf32>, vector<8x128xf32> -> vector<8x128xf32>
    %136 = arith.addf %134, %135 : vector<8x128xf32>
    %137 = arith.negf %136 : vector<8x128xf32>
    %138 = math.exp %137 : vector<8x128xf32>
    %cst_53 = arith.constant 1.000000e+00 : f32
    %139 = vector.broadcast %cst_53 : f32 to vector<8x128xf32>
    %140 = arith.addf %139, %138 : vector<8x128xf32>
    %141 = arith.divf %139, %140 : vector<8x128xf32>
    %142 = math.tanh %136 : vector<8x128xf32>
    %143 = vector.extract_strided_slice %141 {offsets = [0, 0], sizes = [8, 32], strides = [1, 1]} : vector<8x128xf32> to vector<8x32xf32>
    %144 = vector.extract_strided_slice %141 {offsets = [0, 32], sizes = [8, 32], strides = [1, 1]} : vector<8x128xf32> to vector<8x32xf32>
    %145 = vector.extract_strided_slice %142 {offsets = [0, 64], sizes = [8, 32], strides = [1, 1]} : vector<8x128xf32> to vector<8x32xf32>
    %146 = vector.extract_strided_slice %141 {offsets = [0, 96], sizes = [8, 32], strides = [1, 1]} : vector<8x128xf32> to vector<8x32xf32>
    %147 = arith.mulf %144, %124 : vector<8x32xf32>
    %148 = arith.mulf %143, %145 : vector<8x32xf32>
    %149 = arith.addf %147, %148 : vector<8x32xf32>
    %150 = math.tanh %149 : vector<8x32xf32>
    %151 = arith.mulf %146, %150 : vector<8x32xf32>
    %cst_54 = arith.constant dense<0.000000e+00> : vector<8x128xf32>
    %152 = tpu.matmul %151, %4, %cst_54 {dimension_numbers = #tpu.dot_dimension_numbers<[1], [0], [0], [1], [0, 0, 1, 1], [], []>} : vector<8x32xf32>, vector<32x128xf32>, vector<8x128xf32> -> vector<8x128xf32>
    %153 = vector.broadcast %5 : vector<1x128xf32> to vector<8x128xf32>
    %154 = arith.addf %152, %153 : vector<8x128xf32>
    %c5_55 = arith.constant 5 : index
    %c0_56 = arith.constant 0 : index
    %c0_57 = arith.constant 0 : index
    %155 = vector.load %arg5[%c5_55, %c0_56, %c0_57] : memref<8x8x128xf32, #tpu.memory_space<vmem>>, vector<1x8x128xf32>
    %156 = vector.shape_cast %155 : vector<1x8x128xf32> to vector<8x128xf32>
    %157 = vector.shape_cast %154 : vector<8x128xf32> to vector<1x8x128xf32>
    tpu.vector_store %arg5[%c5_55, %c0_56, %c0_57], %157 {strides = array<i32>} : memref<8x8x128xf32, #tpu.memory_space<vmem>>, vector<1x8x128xf32>,
    %c6 = arith.constant 6 : index
    %c0_58 = arith.constant 0 : index
    %c0_59 = arith.constant 0 : index
    %158 = vector.load %arg1[%c6, %c0_58, %c0_59] : memref<8x8x128xf32, #tpu.memory_space<vmem>>, vector<1x8x128xf32>
    %159 = vector.shape_cast %158 : vector<1x8x128xf32> to vector<8x128xf32>
    %cst_60 = arith.constant dense<0.000000e+00> : vector<8x128xf32>
    %160 = tpu.matmul %151, %3, %cst_60 {dimension_numbers = #tpu.dot_dimension_numbers<[1], [0], [0], [1], [0, 0, 1, 1], [], []>} : vector<8x32xf32>, vector<32x128xf32>, vector<8x128xf32> -> vector<8x128xf32>
    %161 = arith.addf %159, %160 : vector<8x128xf32>
    %162 = arith.negf %161 : vector<8x128xf32>
    %163 = math.exp %162 : vector<8x128xf32>
    %cst_61 = arith.constant 1.000000e+00 : f32
    %164 = vector.broadcast %cst_61 : f32 to vector<8x128xf32>
    %165 = arith.addf %164, %163 : vector<8x128xf32>
    %166 = arith.divf %164, %165 : vector<8x128xf32>
    %167 = math.tanh %161 : vector<8x128xf32>
    %168 = vector.extract_strided_slice %166 {offsets = [0, 0], sizes = [8, 32], strides = [1, 1]} : vector<8x128xf32> to vector<8x32xf32>
    %169 = vector.extract_strided_slice %166 {offsets = [0, 32], sizes = [8, 32], strides = [1, 1]} : vector<8x128xf32> to vector<8x32xf32>
    %170 = vector.extract_strided_slice %167 {offsets = [0, 64], sizes = [8, 32], strides = [1, 1]} : vector<8x128xf32> to vector<8x32xf32>
    %171 = vector.extract_strided_slice %166 {offsets = [0, 96], sizes = [8, 32], strides = [1, 1]} : vector<8x128xf32> to vector<8x32xf32>
    %172 = arith.mulf %169, %149 : vector<8x32xf32>
    %173 = arith.mulf %168, %170 : vector<8x32xf32>
    %174 = arith.addf %172, %173 : vector<8x32xf32>
    %175 = math.tanh %174 : vector<8x32xf32>
    %176 = arith.mulf %171, %175 : vector<8x32xf32>
    %cst_62 = arith.constant dense<0.000000e+00> : vector<8x128xf32>
    %177 = tpu.matmul %176, %4, %cst_62 {dimension_numbers = #tpu.dot_dimension_numbers<[1], [0], [0], [1], [0, 0, 1, 1], [], []>} : vector<8x32xf32>, vector<32x128xf32>, vector<8x128xf32> -> vector<8x128xf32>
    %178 = vector.broadcast %5 : vector<1x128xf32> to vector<8x128xf32>
    %179 = arith.addf %177, %178 : vector<8x128xf32>
    %c6_63 = arith.constant 6 : index
    %c0_64 = arith.constant 0 : index
    %c0_65 = arith.constant 0 : index
    %180 = vector.load %arg5[%c6_63, %c0_64, %c0_65] : memref<8x8x128xf32, #tpu.memory_space<vmem>>, vector<1x8x128xf32>
    %181 = vector.shape_cast %180 : vector<1x8x128xf32> to vector<8x128xf32>
    %182 = vector.shape_cast %179 : vector<8x128xf32> to vector<1x8x128xf32>
    tpu.vector_store %arg5[%c6_63, %c0_64, %c0_65], %182 {strides = array<i32>} : memref<8x8x128xf32, #tpu.memory_space<vmem>>, vector<1x8x128xf32>,
    %c7 = arith.constant 7 : index
    %c0_66 = arith.constant 0 : index
    %c0_67 = arith.constant 0 : index
    %183 = vector.load %arg1[%c7, %c0_66, %c0_67] : memref<8x8x128xf32, #tpu.memory_space<vmem>>, vector<1x8x128xf32>
    %184 = vector.shape_cast %183 : vector<1x8x128xf32> to vector<8x128xf32>
    %cst_68 = arith.constant dense<0.000000e+00> : vector<8x128xf32>
    %185 = tpu.matmul %176, %3, %cst_68 {dimension_numbers = #tpu.dot_dimension_numbers<[1], [0], [0], [1], [0, 0, 1, 1], [], []>} : vector<8x32xf32>, vector<32x128xf32>, vector<8x128xf32> -> vector<8x128xf32>
    %186 = arith.addf %184, %185 : vector<8x128xf32>
    %187 = arith.negf %186 : vector<8x128xf32>
    %188 = math.exp %187 : vector<8x128xf32>
    %cst_69 = arith.constant 1.000000e+00 : f32
    %189 = vector.broadcast %cst_69 : f32 to vector<8x128xf32>
    %190 = arith.addf %189, %188 : vector<8x128xf32>
    %191 = arith.divf %189, %190 : vector<8x128xf32>
    %192 = math.tanh %186 : vector<8x128xf32>
    %193 = vector.extract_strided_slice %191 {offsets = [0, 0], sizes = [8, 32], strides = [1, 1]} : vector<8x128xf32> to vector<8x32xf32>
    %194 = vector.extract_strided_slice %191 {offsets = [0, 32], sizes = [8, 32], strides = [1, 1]} : vector<8x128xf32> to vector<8x32xf32>
    %195 = vector.extract_strided_slice %192 {offsets = [0, 64], sizes = [8, 32], strides = [1, 1]} : vector<8x128xf32> to vector<8x32xf32>
    %196 = vector.extract_strided_slice %191 {offsets = [0, 96], sizes = [8, 32], strides = [1, 1]} : vector<8x128xf32> to vector<8x32xf32>
    %197 = arith.mulf %194, %174 : vector<8x32xf32>
    %198 = arith.mulf %193, %195 : vector<8x32xf32>
    %199 = arith.addf %197, %198 : vector<8x32xf32>
    %200 = math.tanh %199 : vector<8x32xf32>
    %201 = arith.mulf %196, %200 : vector<8x32xf32>
    %cst_70 = arith.constant dense<0.000000e+00> : vector<8x128xf32>
    %202 = tpu.matmul %201, %4, %cst_70 {dimension_numbers = #tpu.dot_dimension_numbers<[1], [0], [0], [1], [0, 0, 1, 1], [], []>} : vector<8x32xf32>, vector<32x128xf32>, vector<8x128xf32> -> vector<8x128xf32>
    %203 = vector.broadcast %5 : vector<1x128xf32> to vector<8x128xf32>
    %204 = arith.addf %202, %203 : vector<8x128xf32>
    %c7_71 = arith.constant 7 : index
    %c0_72 = arith.constant 0 : index
    %c0_73 = arith.constant 0 : index
    %205 = vector.load %arg5[%c7_71, %c0_72, %c0_73] : memref<8x8x128xf32, #tpu.memory_space<vmem>>, vector<1x8x128xf32>
    %206 = vector.shape_cast %205 : vector<1x8x128xf32> to vector<8x128xf32>
    %207 = vector.shape_cast %204 : vector<8x128xf32> to vector<1x8x128xf32>
    tpu.vector_store %arg5[%c7_71, %c0_72, %c0_73], %207 {strides = array<i32>} : memref<8x8x128xf32, #tpu.memory_space<vmem>>, vector<1x8x128xf32>,
    %c0_74 = arith.constant 0 : index
    %c0_75 = arith.constant 0 : index
    %208 = vector.load %arg7[%c0_74, %c0_75] : memref<8x32xf32, #tpu.memory_space<vmem>>, vector<8x32xf32>
    tpu.vector_store %arg7[%c0_74, %c0_75], %201 {strides = array<i32>} : memref<8x32xf32, #tpu.memory_space<vmem>>, vector<8x32xf32>,
    %c0_76 = arith.constant 0 : index
    %c0_77 = arith.constant 0 : index
    %209 = vector.load %arg8[%c0_76, %c0_77] : memref<8x32xf32, #tpu.memory_space<vmem>>, vector<8x32xf32>
    tpu.vector_store %arg8[%c0_76, %c0_77], %199 {strides = array<i32>} : memref<8x32xf32, #tpu.memory_space<vmem>>, vector<8x32xf32>,
    return
  }
  func.func @transform_0(%arg0: i32) -> (i32, i32, i32) {
    %c0_i32 = arith.constant 0 : i32
    %c0_i32_0 = arith.constant 0 : i32
    %c0_i32_1 = arith.constant 0 : i32
    return %arg0, %c0_i32, %c0_i32_0 : i32, i32, i32
  }
  func.func @transform_2(%arg0: i32) -> (i32, i32) {
    %c0_i32 = arith.constant 0 : i32
    %c0_i32_0 = arith.constant 0 : i32
    %c0_i32_1 = arith.constant 0 : i32
    return %c0_i32, %c0_i32_0 : i32, i32
  }
  func.func @transform_3(%arg0: i32) -> (i32, i32) {
    %c0_i32 = arith.constant 0 : i32
    %c0_i32_0 = arith.constant 0 : i32
    %c0_i32_1 = arith.constant 0 : i32
    return %c0_i32, %c0_i32_0 : i32, i32
  }
  func.func @transform_4(%arg0: i32) -> (i32, i32, i32) {
    %c0_i32 = arith.constant 0 : i32
    %c0_i32_0 = arith.constant 0 : i32
    %c0_i32_1 = arith.constant 0 : i32
    return %arg0, %c0_i32, %c0_i32_0 : i32, i32, i32
  }
}

module attributes {stable_mosaic.version = 11 : i64} {
  func.func @_lstm_last_fc_kernel(%arg0: i32, %arg1: memref<8x8x128xf32, #tpu.memory_space<vmem>>, %arg2: memref<32x128xf32, #tpu.memory_space<any>>, %arg3: memref<32x4xf32, #tpu.memory_space<vmem>>, %arg4: memref<1x4xf32, #tpu.memory_space<vmem>>, %arg5: memref<8x4xf32, #tpu.memory_space<vmem>>, %arg6: memref<32x128xf32, #tpu.memory_space<vmem>>, %arg7: memref<8x32xf32, #tpu.memory_space<vmem>>, %arg8: memref<8x32xf32, #tpu.memory_space<vmem>>, %arg9: memref<!tpu.dma_semaphore, #tpu.memory_space<semaphore_mem>>) attributes {dimension_semantics = [#tpu.dimension_semantics<arbitrary>], iteration_bounds = array<i64: 1>, scalar_prefetch = 0 : i64, scratch_operands = 4 : i64, tpu.core_type = #tpu.core_type<tc>, window_params = [{transform_indices = @transform_0, window_bounds = array<i64: 8, 8, 128>}, {}, {pipeline_mode = #tpu.pipeline_mode<synchronous>, transform_indices = @transform_2, window_bounds = array<i64: 32, 4>}, {pipeline_mode = #tpu.pipeline_mode<synchronous>, transform_indices = @transform_3, window_bounds = array<i64: 1, 4>}, {pipeline_mode = #tpu.pipeline_mode<synchronous>, transform_indices = @transform_4, window_bounds = array<i64: 8, 4>}]} {
    %c0_i32 = arith.constant 0 : i32
    %0 = arith.cmpi eq, %arg0, %c0_i32 : i32
    %1 = arith.extui %0 : i1 to i32
    %c0_i32_0 = arith.constant 0 : i32
    %2 = arith.cmpi ne, %1, %c0_i32_0 : i32
    scf.if %2 {
      tpu.enqueue_dma source(%arg2 : memref<32x128xf32, #tpu.memory_space<any>>) target(%arg6 : memref<32x128xf32, #tpu.memory_space<vmem>>) target_semaphore(%arg9 : memref<!tpu.dma_semaphore, #tpu.memory_space<semaphore_mem>>)
      %cst_44 = arith.constant 0.000000e+00 : f32
      %163 = vector.broadcast %cst_44 : f32 to vector<8x32xf32>
      %c0_45 = arith.constant 0 : index
      %c0_46 = arith.constant 0 : index
      %164 = vector.load %arg7[%c0_45, %c0_46] : memref<8x32xf32, #tpu.memory_space<vmem>>, vector<8x32xf32>
      tpu.vector_store %arg7[%c0_45, %c0_46], %163 {strides = array<i32>} : memref<8x32xf32, #tpu.memory_space<vmem>>, vector<8x32xf32>,
      %cst_47 = arith.constant 0.000000e+00 : f32
      %165 = vector.broadcast %cst_47 : f32 to vector<8x32xf32>
      %c0_48 = arith.constant 0 : index
      %c0_49 = arith.constant 0 : index
      %166 = vector.load %arg8[%c0_48, %c0_49] : memref<8x32xf32, #tpu.memory_space<vmem>>, vector<8x32xf32>
      tpu.vector_store %arg8[%c0_48, %c0_49], %165 {strides = array<i32>} : memref<8x32xf32, #tpu.memory_space<vmem>>, vector<8x32xf32>,
      %cst_50 = arith.constant 0.000000e+00 : f32
      %167 = vector.broadcast %cst_50 : f32 to vector<8x4xf32>
      %c0_51 = arith.constant 0 : index
      %c0_52 = arith.constant 0 : index
      %168 = vector.load %arg5[%c0_51, %c0_52] : memref<8x4xf32, #tpu.memory_space<vmem>>, vector<8x4xf32>
      tpu.vector_store %arg5[%c0_51, %c0_52], %167 {strides = array<i32>} : memref<8x4xf32, #tpu.memory_space<vmem>>, vector<8x4xf32>,
      tpu.wait_dma2 semaphore(%arg9 : memref<!tpu.dma_semaphore, #tpu.memory_space<semaphore_mem>>) src(%arg2 : memref<32x128xf32, #tpu.memory_space<any>>) dst(%arg6 : memref<32x128xf32, #tpu.memory_space<vmem>>)
    } else {
    }
    %c0 = arith.constant 0 : index
    %c0_1 = arith.constant 0 : index
    %3 = vector.load %arg6[%c0, %c0_1] : memref<32x128xf32, #tpu.memory_space<vmem>>, vector<32x128xf32>
    %c0_2 = arith.constant 0 : index
    %c0_3 = arith.constant 0 : index
    %4 = vector.load %arg7[%c0_2, %c0_3] : memref<8x32xf32, #tpu.memory_space<vmem>>, vector<8x32xf32>
    %c0_4 = arith.constant 0 : index
    %c0_5 = arith.constant 0 : index
    %5 = vector.load %arg8[%c0_4, %c0_5] : memref<8x32xf32, #tpu.memory_space<vmem>>, vector<8x32xf32>
    %c0_6 = arith.constant 0 : index
    %c0_7 = arith.constant 0 : index
    %c0_8 = arith.constant 0 : index
    %6 = vector.load %arg1[%c0_6, %c0_7, %c0_8] : memref<8x8x128xf32, #tpu.memory_space<vmem>>, vector<1x8x128xf32>
    %7 = vector.shape_cast %6 : vector<1x8x128xf32> to vector<8x128xf32>
    %cst = arith.constant dense<0.000000e+00> : vector<8x128xf32>
    %8 = tpu.matmul %4, %3, %cst {dimension_numbers = #tpu.dot_dimension_numbers<[1], [0], [0], [1], [0, 0, 1, 1], [], []>} : vector<8x32xf32>, vector<32x128xf32>, vector<8x128xf32> -> vector<8x128xf32>
    %9 = arith.addf %7, %8 : vector<8x128xf32>
    %10 = arith.negf %9 : vector<8x128xf32>
    %11 = math.exp %10 : vector<8x128xf32>
    %cst_9 = arith.constant 1.000000e+00 : f32
    %12 = vector.broadcast %cst_9 : f32 to vector<8x128xf32>
    %13 = arith.addf %12, %11 : vector<8x128xf32>
    %14 = arith.divf %12, %13 : vector<8x128xf32>
    %15 = math.tanh %9 : vector<8x128xf32>
    %16 = vector.extract_strided_slice %14 {offsets = [0, 0], sizes = [8, 32], strides = [1, 1]} : vector<8x128xf32> to vector<8x32xf32>
    %17 = vector.extract_strided_slice %14 {offsets = [0, 32], sizes = [8, 32], strides = [1, 1]} : vector<8x128xf32> to vector<8x32xf32>
    %18 = vector.extract_strided_slice %15 {offsets = [0, 64], sizes = [8, 32], strides = [1, 1]} : vector<8x128xf32> to vector<8x32xf32>
    %19 = vector.extract_strided_slice %14 {offsets = [0, 96], sizes = [8, 32], strides = [1, 1]} : vector<8x128xf32> to vector<8x32xf32>
    %20 = arith.mulf %17, %5 : vector<8x32xf32>
    %21 = arith.mulf %16, %18 : vector<8x32xf32>
    %22 = arith.addf %20, %21 : vector<8x32xf32>
    %23 = math.tanh %22 : vector<8x32xf32>
    %24 = arith.mulf %19, %23 : vector<8x32xf32>
    %c1 = arith.constant 1 : index
    %c0_10 = arith.constant 0 : index
    %c0_11 = arith.constant 0 : index
    %25 = vector.load %arg1[%c1, %c0_10, %c0_11] : memref<8x8x128xf32, #tpu.memory_space<vmem>>, vector<1x8x128xf32>
    %26 = vector.shape_cast %25 : vector<1x8x128xf32> to vector<8x128xf32>
    %cst_12 = arith.constant dense<0.000000e+00> : vector<8x128xf32>
    %27 = tpu.matmul %24, %3, %cst_12 {dimension_numbers = #tpu.dot_dimension_numbers<[1], [0], [0], [1], [0, 0, 1, 1], [], []>} : vector<8x32xf32>, vector<32x128xf32>, vector<8x128xf32> -> vector<8x128xf32>
    %28 = arith.addf %26, %27 : vector<8x128xf32>
    %29 = arith.negf %28 : vector<8x128xf32>
    %30 = math.exp %29 : vector<8x128xf32>
    %cst_13 = arith.constant 1.000000e+00 : f32
    %31 = vector.broadcast %cst_13 : f32 to vector<8x128xf32>
    %32 = arith.addf %31, %30 : vector<8x128xf32>
    %33 = arith.divf %31, %32 : vector<8x128xf32>
    %34 = math.tanh %28 : vector<8x128xf32>
    %35 = vector.extract_strided_slice %33 {offsets = [0, 0], sizes = [8, 32], strides = [1, 1]} : vector<8x128xf32> to vector<8x32xf32>
    %36 = vector.extract_strided_slice %33 {offsets = [0, 32], sizes = [8, 32], strides = [1, 1]} : vector<8x128xf32> to vector<8x32xf32>
    %37 = vector.extract_strided_slice %34 {offsets = [0, 64], sizes = [8, 32], strides = [1, 1]} : vector<8x128xf32> to vector<8x32xf32>
    %38 = vector.extract_strided_slice %33 {offsets = [0, 96], sizes = [8, 32], strides = [1, 1]} : vector<8x128xf32> to vector<8x32xf32>
    %39 = arith.mulf %36, %22 : vector<8x32xf32>
    %40 = arith.mulf %35, %37 : vector<8x32xf32>
    %41 = arith.addf %39, %40 : vector<8x32xf32>
    %42 = math.tanh %41 : vector<8x32xf32>
    %43 = arith.mulf %38, %42 : vector<8x32xf32>
    %c2 = arith.constant 2 : index
    %c0_14 = arith.constant 0 : index
    %c0_15 = arith.constant 0 : index
    %44 = vector.load %arg1[%c2, %c0_14, %c0_15] : memref<8x8x128xf32, #tpu.memory_space<vmem>>, vector<1x8x128xf32>
    %45 = vector.shape_cast %44 : vector<1x8x128xf32> to vector<8x128xf32>
    %cst_16 = arith.constant dense<0.000000e+00> : vector<8x128xf32>
    %46 = tpu.matmul %43, %3, %cst_16 {dimension_numbers = #tpu.dot_dimension_numbers<[1], [0], [0], [1], [0, 0, 1, 1], [], []>} : vector<8x32xf32>, vector<32x128xf32>, vector<8x128xf32> -> vector<8x128xf32>
    %47 = arith.addf %45, %46 : vector<8x128xf32>
    %48 = arith.negf %47 : vector<8x128xf32>
    %49 = math.exp %48 : vector<8x128xf32>
    %cst_17 = arith.constant 1.000000e+00 : f32
    %50 = vector.broadcast %cst_17 : f32 to vector<8x128xf32>
    %51 = arith.addf %50, %49 : vector<8x128xf32>
    %52 = arith.divf %50, %51 : vector<8x128xf32>
    %53 = math.tanh %47 : vector<8x128xf32>
    %54 = vector.extract_strided_slice %52 {offsets = [0, 0], sizes = [8, 32], strides = [1, 1]} : vector<8x128xf32> to vector<8x32xf32>
    %55 = vector.extract_strided_slice %52 {offsets = [0, 32], sizes = [8, 32], strides = [1, 1]} : vector<8x128xf32> to vector<8x32xf32>
    %56 = vector.extract_strided_slice %53 {offsets = [0, 64], sizes = [8, 32], strides = [1, 1]} : vector<8x128xf32> to vector<8x32xf32>
    %57 = vector.extract_strided_slice %52 {offsets = [0, 96], sizes = [8, 32], strides = [1, 1]} : vector<8x128xf32> to vector<8x32xf32>
    %58 = arith.mulf %55, %41 : vector<8x32xf32>
    %59 = arith.mulf %54, %56 : vector<8x32xf32>
    %60 = arith.addf %58, %59 : vector<8x32xf32>
    %61 = math.tanh %60 : vector<8x32xf32>
    %62 = arith.mulf %57, %61 : vector<8x32xf32>
    %c3 = arith.constant 3 : index
    %c0_18 = arith.constant 0 : index
    %c0_19 = arith.constant 0 : index
    %63 = vector.load %arg1[%c3, %c0_18, %c0_19] : memref<8x8x128xf32, #tpu.memory_space<vmem>>, vector<1x8x128xf32>
    %64 = vector.shape_cast %63 : vector<1x8x128xf32> to vector<8x128xf32>
    %cst_20 = arith.constant dense<0.000000e+00> : vector<8x128xf32>
    %65 = tpu.matmul %62, %3, %cst_20 {dimension_numbers = #tpu.dot_dimension_numbers<[1], [0], [0], [1], [0, 0, 1, 1], [], []>} : vector<8x32xf32>, vector<32x128xf32>, vector<8x128xf32> -> vector<8x128xf32>
    %66 = arith.addf %64, %65 : vector<8x128xf32>
    %67 = arith.negf %66 : vector<8x128xf32>
    %68 = math.exp %67 : vector<8x128xf32>
    %cst_21 = arith.constant 1.000000e+00 : f32
    %69 = vector.broadcast %cst_21 : f32 to vector<8x128xf32>
    %70 = arith.addf %69, %68 : vector<8x128xf32>
    %71 = arith.divf %69, %70 : vector<8x128xf32>
    %72 = math.tanh %66 : vector<8x128xf32>
    %73 = vector.extract_strided_slice %71 {offsets = [0, 0], sizes = [8, 32], strides = [1, 1]} : vector<8x128xf32> to vector<8x32xf32>
    %74 = vector.extract_strided_slice %71 {offsets = [0, 32], sizes = [8, 32], strides = [1, 1]} : vector<8x128xf32> to vector<8x32xf32>
    %75 = vector.extract_strided_slice %72 {offsets = [0, 64], sizes = [8, 32], strides = [1, 1]} : vector<8x128xf32> to vector<8x32xf32>
    %76 = vector.extract_strided_slice %71 {offsets = [0, 96], sizes = [8, 32], strides = [1, 1]} : vector<8x128xf32> to vector<8x32xf32>
    %77 = arith.mulf %74, %60 : vector<8x32xf32>
    %78 = arith.mulf %73, %75 : vector<8x32xf32>
    %79 = arith.addf %77, %78 : vector<8x32xf32>
    %80 = math.tanh %79 : vector<8x32xf32>
    %81 = arith.mulf %76, %80 : vector<8x32xf32>
    %c4 = arith.constant 4 : index
    %c0_22 = arith.constant 0 : index
    %c0_23 = arith.constant 0 : index
    %82 = vector.load %arg1[%c4, %c0_22, %c0_23] : memref<8x8x128xf32, #tpu.memory_space<vmem>>, vector<1x8x128xf32>
    %83 = vector.shape_cast %82 : vector<1x8x128xf32> to vector<8x128xf32>
    %cst_24 = arith.constant dense<0.000000e+00> : vector<8x128xf32>
    %84 = tpu.matmul %81, %3, %cst_24 {dimension_numbers = #tpu.dot_dimension_numbers<[1], [0], [0], [1], [0, 0, 1, 1], [], []>} : vector<8x32xf32>, vector<32x128xf32>, vector<8x128xf32> -> vector<8x128xf32>
    %85 = arith.addf %83, %84 : vector<8x128xf32>
    %86 = arith.negf %85 : vector<8x128xf32>
    %87 = math.exp %86 : vector<8x128xf32>
    %cst_25 = arith.constant 1.000000e+00 : f32
    %88 = vector.broadcast %cst_25 : f32 to vector<8x128xf32>
    %89 = arith.addf %88, %87 : vector<8x128xf32>
    %90 = arith.divf %88, %89 : vector<8x128xf32>
    %91 = math.tanh %85 : vector<8x128xf32>
    %92 = vector.extract_strided_slice %90 {offsets = [0, 0], sizes = [8, 32], strides = [1, 1]} : vector<8x128xf32> to vector<8x32xf32>
    %93 = vector.extract_strided_slice %90 {offsets = [0, 32], sizes = [8, 32], strides = [1, 1]} : vector<8x128xf32> to vector<8x32xf32>
    %94 = vector.extract_strided_slice %91 {offsets = [0, 64], sizes = [8, 32], strides = [1, 1]} : vector<8x128xf32> to vector<8x32xf32>
    %95 = vector.extract_strided_slice %90 {offsets = [0, 96], sizes = [8, 32], strides = [1, 1]} : vector<8x128xf32> to vector<8x32xf32>
    %96 = arith.mulf %93, %79 : vector<8x32xf32>
    %97 = arith.mulf %92, %94 : vector<8x32xf32>
    %98 = arith.addf %96, %97 : vector<8x32xf32>
    %99 = math.tanh %98 : vector<8x32xf32>
    %100 = arith.mulf %95, %99 : vector<8x32xf32>
    %c5 = arith.constant 5 : index
    %c0_26 = arith.constant 0 : index
    %c0_27 = arith.constant 0 : index
    %101 = vector.load %arg1[%c5, %c0_26, %c0_27] : memref<8x8x128xf32, #tpu.memory_space<vmem>>, vector<1x8x128xf32>
    %102 = vector.shape_cast %101 : vector<1x8x128xf32> to vector<8x128xf32>
    %cst_28 = arith.constant dense<0.000000e+00> : vector<8x128xf32>
    %103 = tpu.matmul %100, %3, %cst_28 {dimension_numbers = #tpu.dot_dimension_numbers<[1], [0], [0], [1], [0, 0, 1, 1], [], []>} : vector<8x32xf32>, vector<32x128xf32>, vector<8x128xf32> -> vector<8x128xf32>
    %104 = arith.addf %102, %103 : vector<8x128xf32>
    %105 = arith.negf %104 : vector<8x128xf32>
    %106 = math.exp %105 : vector<8x128xf32>
    %cst_29 = arith.constant 1.000000e+00 : f32
    %107 = vector.broadcast %cst_29 : f32 to vector<8x128xf32>
    %108 = arith.addf %107, %106 : vector<8x128xf32>
    %109 = arith.divf %107, %108 : vector<8x128xf32>
    %110 = math.tanh %104 : vector<8x128xf32>
    %111 = vector.extract_strided_slice %109 {offsets = [0, 0], sizes = [8, 32], strides = [1, 1]} : vector<8x128xf32> to vector<8x32xf32>
    %112 = vector.extract_strided_slice %109 {offsets = [0, 32], sizes = [8, 32], strides = [1, 1]} : vector<8x128xf32> to vector<8x32xf32>
    %113 = vector.extract_strided_slice %110 {offsets = [0, 64], sizes = [8, 32], strides = [1, 1]} : vector<8x128xf32> to vector<8x32xf32>
    %114 = vector.extract_strided_slice %109 {offsets = [0, 96], sizes = [8, 32], strides = [1, 1]} : vector<8x128xf32> to vector<8x32xf32>
    %115 = arith.mulf %112, %98 : vector<8x32xf32>
    %116 = arith.mulf %111, %113 : vector<8x32xf32>
    %117 = arith.addf %115, %116 : vector<8x32xf32>
    %118 = math.tanh %117 : vector<8x32xf32>
    %119 = arith.mulf %114, %118 : vector<8x32xf32>
    %c6 = arith.constant 6 : index
    %c0_30 = arith.constant 0 : index
    %c0_31 = arith.constant 0 : index
    %120 = vector.load %arg1[%c6, %c0_30, %c0_31] : memref<8x8x128xf32, #tpu.memory_space<vmem>>, vector<1x8x128xf32>
    %121 = vector.shape_cast %120 : vector<1x8x128xf32> to vector<8x128xf32>
    %cst_32 = arith.constant dense<0.000000e+00> : vector<8x128xf32>
    %122 = tpu.matmul %119, %3, %cst_32 {dimension_numbers = #tpu.dot_dimension_numbers<[1], [0], [0], [1], [0, 0, 1, 1], [], []>} : vector<8x32xf32>, vector<32x128xf32>, vector<8x128xf32> -> vector<8x128xf32>
    %123 = arith.addf %121, %122 : vector<8x128xf32>
    %124 = arith.negf %123 : vector<8x128xf32>
    %125 = math.exp %124 : vector<8x128xf32>
    %cst_33 = arith.constant 1.000000e+00 : f32
    %126 = vector.broadcast %cst_33 : f32 to vector<8x128xf32>
    %127 = arith.addf %126, %125 : vector<8x128xf32>
    %128 = arith.divf %126, %127 : vector<8x128xf32>
    %129 = math.tanh %123 : vector<8x128xf32>
    %130 = vector.extract_strided_slice %128 {offsets = [0, 0], sizes = [8, 32], strides = [1, 1]} : vector<8x128xf32> to vector<8x32xf32>
    %131 = vector.extract_strided_slice %128 {offsets = [0, 32], sizes = [8, 32], strides = [1, 1]} : vector<8x128xf32> to vector<8x32xf32>
    %132 = vector.extract_strided_slice %129 {offsets = [0, 64], sizes = [8, 32], strides = [1, 1]} : vector<8x128xf32> to vector<8x32xf32>
    %133 = vector.extract_strided_slice %128 {offsets = [0, 96], sizes = [8, 32], strides = [1, 1]} : vector<8x128xf32> to vector<8x32xf32>
    %134 = arith.mulf %131, %117 : vector<8x32xf32>
    %135 = arith.mulf %130, %132 : vector<8x32xf32>
    %136 = arith.addf %134, %135 : vector<8x32xf32>
    %137 = math.tanh %136 : vector<8x32xf32>
    %138 = arith.mulf %133, %137 : vector<8x32xf32>
    %c7 = arith.constant 7 : index
    %c0_34 = arith.constant 0 : index
    %c0_35 = arith.constant 0 : index
    %139 = vector.load %arg1[%c7, %c0_34, %c0_35] : memref<8x8x128xf32, #tpu.memory_space<vmem>>, vector<1x8x128xf32>
    %140 = vector.shape_cast %139 : vector<1x8x128xf32> to vector<8x128xf32>
    %cst_36 = arith.constant dense<0.000000e+00> : vector<8x128xf32>
    %141 = tpu.matmul %138, %3, %cst_36 {dimension_numbers = #tpu.dot_dimension_numbers<[1], [0], [0], [1], [0, 0, 1, 1], [], []>} : vector<8x32xf32>, vector<32x128xf32>, vector<8x128xf32> -> vector<8x128xf32>
    %142 = arith.addf %140, %141 : vector<8x128xf32>
    %143 = arith.negf %142 : vector<8x128xf32>
    %144 = math.exp %143 : vector<8x128xf32>
    %cst_37 = arith.constant 1.000000e+00 : f32
    %145 = vector.broadcast %cst_37 : f32 to vector<8x128xf32>
    %146 = arith.addf %145, %144 : vector<8x128xf32>
    %147 = arith.divf %145, %146 : vector<8x128xf32>
    %148 = math.tanh %142 : vector<8x128xf32>
    %149 = vector.extract_strided_slice %147 {offsets = [0, 0], sizes = [8, 32], strides = [1, 1]} : vector<8x128xf32> to vector<8x32xf32>
    %150 = vector.extract_strided_slice %147 {offsets = [0, 32], sizes = [8, 32], strides = [1, 1]} : vector<8x128xf32> to vector<8x32xf32>
    %151 = vector.extract_strided_slice %148 {offsets = [0, 64], sizes = [8, 32], strides = [1, 1]} : vector<8x128xf32> to vector<8x32xf32>
    %152 = vector.extract_strided_slice %147 {offsets = [0, 96], sizes = [8, 32], strides = [1, 1]} : vector<8x128xf32> to vector<8x32xf32>
    %153 = arith.mulf %150, %136 : vector<8x32xf32>
    %154 = arith.mulf %149, %151 : vector<8x32xf32>
    %155 = arith.addf %153, %154 : vector<8x32xf32>
    %156 = math.tanh %155 : vector<8x32xf32>
    %157 = arith.mulf %152, %156 : vector<8x32xf32>
    %c0_38 = arith.constant 0 : index
    %c0_39 = arith.constant 0 : index
    %158 = vector.load %arg7[%c0_38, %c0_39] : memref<8x32xf32, #tpu.memory_space<vmem>>, vector<8x32xf32>
    tpu.vector_store %arg7[%c0_38, %c0_39], %157 {strides = array<i32>} : memref<8x32xf32, #tpu.memory_space<vmem>>, vector<8x32xf32>,
    %c0_40 = arith.constant 0 : index
    %c0_41 = arith.constant 0 : index
    %159 = vector.load %arg8[%c0_40, %c0_41] : memref<8x32xf32, #tpu.memory_space<vmem>>, vector<8x32xf32>
    tpu.vector_store %arg8[%c0_40, %c0_41], %155 {strides = array<i32>} : memref<8x32xf32, #tpu.memory_space<vmem>>, vector<8x32xf32>,
    %c0_i32_42 = arith.constant 0 : i32
    %160 = arith.cmpi eq, %arg0, %c0_i32_42 : i32
    %161 = arith.extui %160 : i1 to i32
    %c0_i32_43 = arith.constant 0 : i32
    %162 = arith.cmpi ne, %161, %c0_i32_43 : i32
    scf.if %162 {
      %c0_44 = arith.constant 0 : index
      %c0_45 = arith.constant 0 : index
      %163 = vector.load %arg3[%c0_44, %c0_45] : memref<32x4xf32, #tpu.memory_space<vmem>>, vector<32x4xf32>
      %cst_46 = arith.constant dense<0.000000e+00> : vector<8x4xf32>
      %164 = tpu.matmul %157, %163, %cst_46 {dimension_numbers = #tpu.dot_dimension_numbers<[1], [0], [0], [1], [0, 0, 1, 1], [], []>} : vector<8x32xf32>, vector<32x4xf32>, vector<8x4xf32> -> vector<8x4xf32>
      %c0_47 = arith.constant 0 : index
      %c0_48 = arith.constant 0 : index
      %165 = vector.load %arg4[%c0_47, %c0_48] : memref<1x4xf32, #tpu.memory_space<vmem>>, vector<1x4xf32>
      %166 = vector.broadcast %165 : vector<1x4xf32> to vector<8x4xf32>
      %167 = arith.addf %164, %166 : vector<8x4xf32>
      %c0_49 = arith.constant 0 : index
      %c0_50 = arith.constant 0 : index
      %168 = vector.load %arg5[%c0_49, %c0_50] : memref<8x4xf32, #tpu.memory_space<vmem>>, vector<8x4xf32>
      tpu.vector_store %arg5[%c0_49, %c0_50], %167 {strides = array<i32>} : memref<8x4xf32, #tpu.memory_space<vmem>>, vector<8x4xf32>,
    } else {
    }
    return
  }
  func.func @transform_0(%arg0: i32) -> (i32, i32, i32) {
    %c0_i32 = arith.constant 0 : i32
    %c0_i32_0 = arith.constant 0 : i32
    %c0_i32_1 = arith.constant 0 : i32
    return %arg0, %c0_i32, %c0_i32_0 : i32, i32, i32
  }
  func.func @transform_2(%arg0: i32) -> (i32, i32) {
    %c0_i32 = arith.constant 0 : i32
    %c0_i32_0 = arith.constant 0 : i32
    %c0_i32_1 = arith.constant 0 : i32
    return %c0_i32, %c0_i32_0 : i32, i32
  }
  func.func @transform_3(%arg0: i32) -> (i32, i32) {
    %c0_i32 = arith.constant 0 : i32
    %c0_i32_0 = arith.constant 0 : i32
    %c0_i32_1 = arith.constant 0 : i32
    return %c0_i32, %c0_i32_0 : i32, i32
  }
  func.func @transform_4(%arg0: i32) -> (i32, i32) {
    %c0_i32 = arith.constant 0 : i32
    %c0_i32_0 = arith.constant 0 : i32
    %c0_i32_1 = arith.constant 0 : i32
    return %c0_i32, %c0_i32_0 : i32, i32
  }
}

</mosaic_0001>

<bundles_post_ra>
// kernel: my_model_forward.3
= control target key start
LH: loop header
LB: loop body
LE: loop exit
PB: predicated region body
PF: predicated region fallthrough
CT: control target
= control target key end

     0   :  { %s868_s0 = inlined_call_operand.vmem [shape: f32[8,8,128], index: 0, kind: input, shape index: {}]   ;;  %s869_s1 = inlined_call_operand.vmem [shape: f32[32,128], index: 1, kind: input, shape index: {}]   ;;  %s870_s2 = inlined_call_operand.vmem [shape: f32[32,4], index: 2, kind: input, shape index: {}]   ;;  %s871_s3 = inlined_call_operand.vmem [shape: f32[1,4], index: 3, kind: input, shape index: {}]   ;;  %s872_s4 = inlined_call_operand.vmem [shape: f32[8,4], index: 4, kind: output, shape index: {}]  }
   0x1   :  { %v29_v0 = vld [vmem:[%s869_s1] sm:$0xff]  ;;  %v31_v1 = vld [vmem:[%s869_s1 + $0x8] sm:$0xff]  ;;  %v33_v2 = vld [vmem:[%s869_s1 + $0x10] sm:$0xff] }
   0x2   :  { %v35_v3 = vld [vmem:[%s869_s1 + $0x18] sm:$0xff] }
   0x3   :  { %42 = vsyncadd [#allocation5], 512  ;;  %vm43_vm0 = vcmask 261120   ;;  %vm46_vm1 = vcmask 31744   ;;  %v734_v4 = vmov 0.0  }
   0x4   :  { %44 = vst.msk [vmem:[#allocation3] sm:$0xff] %vm43_vm0, %v734_v4 }
   0x5   :  { %45 = vst.msk [vmem:[#allocation4] sm:$0xff] %vm43_vm0, %v734_v4 }
   0x6   :  { %47 = vst.msk [vmem:[%s872_s4] sm:$0xff] %vm46_vm1, %v734_v4 }
   0x7   :  { %732 = dma.done.wait [#allocation5], 512 }
   0x8   :  { %733 = vsyncadd [#allocation5], 4294966784  ;;  %74 = vmatpush.msra.mxu0 %v35_v3  ;;  %143 = vmatpush.msra.mxu1 %v35_v3  ;;  %v57_v6 = vld [vmem:[%s868_s0] sm:$0xff]  ;;  %s735_s26 = smov 64   ;;  %s736_s27 = smov 32   ;;  %v640_v34 = vld [vmem:[%s868_s0 + $0x8] sm:$0xff] }
   0x9   :  { %208 = vmatpush.msra.mxu2 %v35_v3  ;;  %273 = vmatpush.msra.mxu3 %v35_v3  ;;  %v643_v60 = vld [vmem:[%s868_s0 + $0x10] sm:$0xff] }
   0xa   :  { %75 = vmatpush.msra.mxu0 %v33_v2  ;;  %144 = vmatpush.msra.mxu1 %v33_v2 }
   0xb   :  { %209 = vmatpush.msra.mxu2 %v33_v2  ;;  %274 = vmatpush.msra.mxu3 %v33_v2  ;;  %v55_v5 = vld [vmem:[#allocation3] sm:$0xff] }
   0xc   :  { %76 = vmatpush.msra.mxu0 %v31_v1  ;;  %145 = vmatpush.msra.mxu1 %v31_v1  ;;  %v56_v10 = vld [vmem:[#allocation4] sm:$0xff] }
   0xd   :  { %210 = vmatpush.msra.mxu2 %v31_v1  ;;  %275 = vmatpush.msra.mxu3 %v31_v1 }
   0xe   :  { %77 = vmatpush.msra.mxu0 %v29_v0  ;;  %146 = vmatpush.msra.mxu1 %v29_v0 }
   0xf   :  { %211 = vmatpush.msra.mxu2 %v29_v0  ;;  %276 = vmatpush.msra.mxu3 %v29_v0 }
  0x10   :  { %638 = vmatmul.msk.f32.vlgmr.msra.gmra.mxu0 %vm43_vm0, %v55_v5  ;;  %403 = vmatpush.msrb.mxu1 %v35_v3 }
  0x11   :  { %338 = vmatpush.msrb.mxu0 %v35_v3  ;;  %468 = vmatpush.msrb.mxu2 %v35_v3 }
  0x12   :  { %404 = vmatpush.msrb.mxu1 %v33_v2  ;;  %533 = vmatpush.msrb.mxu3 %v35_v3 }
  0x13   :  { %339 = vmatpush.msrb.mxu0 %v33_v2  ;;  %469 = vmatpush.msrb.mxu2 %v33_v2 }
  0x14   :  { %405 = vmatpush.msrb.mxu1 %v31_v1  ;;  %534 = vmatpush.msrb.mxu3 %v33_v2 }
  0x15   :  { %340 = vmatpush.msrb.mxu0 %v31_v1  ;;  %470 = vmatpush.msrb.mxu2 %v31_v1 }
  0x16   :  { %406 = vmatpush.msrb.mxu1 %v29_v0  ;;  %535 = vmatpush.msrb.mxu3 %v31_v1 }
  0x17   :  { %341 = vmatpush.msrb.mxu0 %v29_v0  ;;  %471 = vmatpush.msrb.mxu2 %v29_v0 }
  0x18   :  { %536 = vmatpush.msrb.mxu3 %v29_v0 }
  0x8d   :  { %v79_v7 = vpop.f32.mrf.mxu0 }
  0x8e   :  { %v82_v8 = vadd.f32 %v79_v7, %v57_v6 }
  0x90   :  { %668 = vtanh.f32 %v82_v8  ;;  %v639_v11 = vmul.f32 -1.442695, %v82_v8 }
  0x92   :  { %670 = vpow2.f32 %v639_v11 }
  0x96   :  { %v669_v9 = vpop.eup %668 }
  0x97   :  { %109 = vrot.lane.b32.xlu0 %v669_v9, %s735_s26 }
  0x98   :  { %v671_v12 = vpop.eup %670 }
  0x99   :  { %v86_v13 = vadd.f32 1.0, %v671_v12 }
  0x9b   :  { %672 = vrcp.f32 %v86_v13  ;;  %v98_v19 = vand.u32 2147483648, %v86_v13  ;;  %vm92_vm3 = vweird.f32 %v86_v13  ;;  %v96_v20 = vand.u32 2147483647, %v86_v13 }
  0x9d   :  { %v99_v22 = vor.u32 1.1754944e-38, %v98_v19  ;;  %vm97_vm5 = vcmp.eq.f32.partialorder %v96_v20, 8.507059e+37 }
  0x9f   :  { %104 = vrot.lane.b32.xlu0 %v56_v10, %s736_s27 }
  0xa1   :  { %v673_v14 = vpop.eup %672 }
  0xa2   :  { %v88_v15 = vmul.f32 %v673_v14, %v86_v13  ;;  %vm93_vm2 = vweird.f32 %v673_v14 }
  0xa3   :  { %vm94_vm4 = vmor %vm92_vm3, %vm93_vm2 }
  0xa4   :  { %v89_v16 = vsub.f32 1.0, %v88_v15 }
  0xa6   :  { %v90_v17 = vmul.f32 %v673_v14, %v89_v16 }
  0xa8   :  { %v91_v18 = vadd.f32 %v673_v14, %v90_v17 }
  0xaa   :  { %v95_v21 = vsel %vm94_vm4, %v673_v14, %v91_v18 }
  0xab   :  { %v100_v24 = vsel %vm97_vm5, %v99_v22, %v95_v21  ;;  %v646_v22 = vld [vmem:[%s868_s0 + $0x18] sm:$0xff] }
 0x109   :  { %v110_v23 = vpop.permute.xlu0 %109 }
 0x10a   :  { %v112_v25 = vmul.f32 %v110_v23, %v100_v24 }
 0x10c   :  { %114 = vrot.lane.b32.xlu1 %v112_v25, %s736_s27 }
 0x111   :  { %v105_v26 = vpop.permute.xlu0 %104 }
 0x112   :  { %v107_v27 = vmul.f32 %v105_v26, %v100_v24 }
 0x17e   :  { %v115_v28 = vpop.permute.xlu1 %114 }
 0x17f   :  { %v117_v29 = vadd.f32 %v115_v28, %v107_v27 }
 0x181   :  { %674 = vtanh.f32 %v117_v29 }
 0x187   :  { %v675_v30 = vpop.eup %674 }
 0x188   :  { %120 = vrot.lane.b32.xlu1 %v675_v30, %s735_s26 }
 0x1fa   :  { %v121_v31 = vpop.permute.xlu1 %120 }
 0x1fb   :  { %v123_v32 = vmul.f32 %v121_v31, %v100_v24 }
 0x1fd   :  { %127 = vrot.lane.b32.xlu2 %v123_v32, %s736_s27 }
 0x257   :  { %v128_v33 = vpop.permute.xlu2 %127 }
 0x258   :  { %641 = vmatmul.msk.f32.vlgmr.msra.gmra.mxu1 %vm43_vm0, %v128_v33 }
 0x2d5   :  { %v148_v35 = vpop.f32.mrf.mxu1 }
 0x2d6   :  { %v151_v36 = vadd.f32 %v640_v34, %v148_v35 }
 0x2d8   :  { %676 = vtanh.f32 %v151_v36  ;;  %v642_v38 = vmul.f32 -1.442695, %v151_v36 }
 0x2da   :  { %678 = vpow2.f32 %v642_v38 }
 0x2de   :  { %v677_v37 = vpop.eup %676 }
 0x2df   :  { %174 = vrot.lane.b32.xlu2 %v677_v37, %s735_s26 }
 0x2e0   :  { %v679_v39 = vpop.eup %678 }
 0x2e1   :  { %v155_v40 = vadd.f32 1.0, %v679_v39 }
 0x2e3   :  { %680 = vrcp.f32 %v155_v40  ;;  %v167_v46 = vand.u32 2147483648, %v155_v40  ;;  %vm161_vm7 = vweird.f32 %v155_v40  ;;  %v165_v47 = vand.u32 2147483647, %v155_v40 }
 0x2e5   :  { %v168_v49 = vor.u32 1.1754944e-38, %v167_v46  ;;  %vm166_vm9 = vcmp.eq.f32.partialorder %v165_v47, 8.507059e+37 }
 0x2e9   :  { %v681_v41 = vpop.eup %680 }
 0x2ea   :  { %v157_v42 = vmul.f32 %v681_v41, %v155_v40  ;;  %vm162_vm6 = vweird.f32 %v681_v41 }
 0x2eb   :  { %vm163_vm8 = vmor %vm161_vm7, %vm162_vm6 }
 0x2ec   :  { %v158_v43 = vsub.f32 1.0, %v157_v42 }
 0x2ee   :  { %v159_v44 = vmul.f32 %v681_v41, %v158_v43 }
 0x2f0   :  { %v160_v45 = vadd.f32 %v681_v41, %v159_v44 }
 0x2f2   :  { %v164_v48 = vsel %vm163_vm8, %v681_v41, %v160_v45 }
 0x2f3   :  { %v169_v51 = vsel %vm166_vm9, %v168_v49, %v164_v48  ;;  %v649_v48 = vld [vmem:[%s868_s0 + $0x20] sm:$0xff] }
 0x2f4   :  { %v172_v53 = vmul.f32 %v169_v51, %v117_v29 }
 0x339   :  { %v175_v50 = vpop.permute.xlu2 %174 }
 0x33a   :  { %v177_v52 = vmul.f32 %v175_v50, %v169_v51 }
 0x33c   :  { %179 = vrot.lane.b32.xlu0 %v177_v52, %s736_s27 }
 0x3ae   :  { %v180_v54 = vpop.permute.xlu0 %179 }
 0x3af   :  { %v182_v55 = vadd.f32 %v180_v54, %v172_v53 }
 0x3b1   :  { %682 = vtanh.f32 %v182_v55 }
 0x3b7   :  { %v683_v56 = vpop.eup %682 }
 0x3b8   :  { %185 = vrot.lane.b32.xlu1 %v683_v56, %s735_s26 }
 0x42a   :  { %v186_v57 = vpop.permute.xlu1 %185 }
 0x42b   :  { %v188_v58 = vmul.f32 %v186_v57, %v169_v51 }
 0x42d   :  { %192 = vrot.lane.b32.xlu2 %v188_v58, %s736_s27 }
 0x487   :  { %v193_v59 = vpop.permute.xlu2 %192 }
 0x488   :  { %644 = vmatmul.msk.f32.vlgmr.msra.gmra.mxu2 %vm43_vm0, %v193_v59 }
 0x50b   :  { %v213_v61 = vpop.f32.mrf.mxu2 }
 0x50c   :  { %v216_v62 = vadd.f32 %v643_v60, %v213_v61 }
 0x50e   :  { %684 = vtanh.f32 %v216_v62  ;;  %v645_v0 = vmul.f32 -1.442695, %v216_v62 }
 0x510   :  { %686 = vpow2.f32 %v645_v0 }
 0x514   :  { %v685_v63 = vpop.eup %684 }
 0x515   :  { %239 = vrot.lane.b32.xlu0 %v685_v63, %s735_s26 }
 0x516   :  { %v687_v1 = vpop.eup %686 }
 0x517   :  { %v220_v2 = vadd.f32 1.0, %v687_v1 }
 0x519   :  { %688 = vrcp.f32 %v220_v2  ;;  %v232_v8 = vand.u32 2147483648, %v220_v2  ;;  %vm226_vm11 = vweird.f32 %v220_v2  ;;  %v230_v9 = vand.u32 2147483647, %v220_v2 }
 0x51b   :  { %v233_v11 = vor.u32 1.1754944e-38, %v232_v8  ;;  %vm231_vm13 = vcmp.eq.f32.partialorder %v230_v9, 8.507059e+37 }
 0x51f   :  { %v689_v3 = vpop.eup %688 }
 0x520   :  { %v222_v4 = vmul.f32 %v689_v3, %v220_v2  ;;  %vm227_vm10 = vweird.f32 %v689_v3 }
 0x521   :  { %vm228_vm12 = vmor %vm226_vm11, %vm227_vm10 }
 0x522   :  { %v223_v5 = vsub.f32 1.0, %v222_v4 }
 0x524   :  { %v224_v6 = vmul.f32 %v689_v3, %v223_v5 }
 0x526   :  { %v225_v7 = vadd.f32 %v689_v3, %v224_v6 }
 0x528   :  { %v229_v10 = vsel %vm228_vm12, %v689_v3, %v225_v7 }
 0x529   :  { %v234_v13 = vsel %vm231_vm13, %v233_v11, %v229_v10  ;;  %v652_v10 = vld [vmem:[%s868_s0 + $0x28] sm:$0xff] }
 0x52a   :  { %v237_v15 = vmul.f32 %v234_v13, %v182_v55 }
 0x587   :  { %v240_v12 = vpop.permute.xlu0 %239 }
 0x588   :  { %v242_v14 = vmul.f32 %v240_v12, %v234_v13 }
 0x58a   :  { %244 = vrot.lane.b32.xlu1 %v242_v14, %s736_s27 }
 0x5fc   :  { %v245_v16 = vpop.permute.xlu1 %244 }
 0x5fd   :  { %v247_v17 = vadd.f32 %v245_v16, %v237_v15 }
 0x5ff   :  { %690 = vtanh.f32 %v247_v17 }
 0x605   :  { %v691_v18 = vpop.eup %690 }
 0x606   :  { %250 = vrot.lane.b32.xlu2 %v691_v18, %s735_s26 }
 0x660   :  { %v251_v19 = vpop.permute.xlu2 %250 }
 0x661   :  { %v253_v20 = vmul.f32 %v251_v19, %v234_v13 }
 0x663   :  { %257 = vrot.lane.b32.xlu0 %v253_v20, %s736_s27 }
 0x6d5   :  { %v258_v21 = vpop.permute.xlu0 %257 }
 0x6d6   :  { %647 = vmatmul.msk.f32.vlgmr.msra.gmra.mxu3 %vm43_vm0, %v258_v21 }
 0x759   :  { %v278_v23 = vpop.f32.mrf.mxu3 }
 0x75a   :  { %v281_v24 = vadd.f32 %v646_v22, %v278_v23 }
 0x75c   :  { %692 = vtanh.f32 %v281_v24  ;;  %v648_v26 = vmul.f32 -1.442695, %v281_v24 }
 0x75e   :  { %694 = vpow2.f32 %v648_v26 }
 0x762   :  { %v693_v25 = vpop.eup %692 }
 0x763   :  { %304 = vrot.lane.b32.xlu1 %v693_v25, %s735_s26 }
 0x764   :  { %v695_v27 = vpop.eup %694 }
 0x765   :  { %v285_v28 = vadd.f32 1.0, %v695_v27 }
 0x767   :  { %696 = vrcp.f32 %v285_v28  ;;  %v297_v34 = vand.u32 2147483648, %v285_v28  ;;  %vm291_vm15 = vweird.f32 %v285_v28  ;;  %v295_v35 = vand.u32 2147483647, %v285_v28 }
 0x769   :  { %v298_v37 = vor.u32 1.1754944e-38, %v297_v34  ;;  %vm296_vm3 = vcmp.eq.f32.partialorder %v295_v35, 8.507059e+37 }
 0x76d   :  { %v697_v29 = vpop.eup %696 }
 0x76e   :  { %v287_v30 = vmul.f32 %v697_v29, %v285_v28  ;;  %vm292_vm14 = vweird.f32 %v697_v29 }
 0x76f   :  { %vm293_vm2 = vmor %vm291_vm15, %vm292_vm14 }
 0x770   :  { %v288_v31 = vsub.f32 1.0, %v287_v30 }
 0x772   :  { %v289_v32 = vmul.f32 %v697_v29, %v288_v31 }
 0x774   :  { %v290_v33 = vadd.f32 %v697_v29, %v289_v32 }
 0x776   :  { %v294_v36 = vsel %vm293_vm2, %v697_v29, %v290_v33 }
 0x777   :  { %v299_v39 = vsel %vm296_vm3, %v298_v37, %v294_v36  ;;  %v655_v36 = vld [vmem:[%s868_s0 + $0x30] sm:$0xff] }
 0x778   :  { %v302_v41 = vmul.f32 %v299_v39, %v247_v17 }
 0x7d5   :  { %v305_v38 = vpop.permute.xlu1 %304 }
 0x7d6   :  { %v307_v40 = vmul.f32 %v305_v38, %v299_v39 }
 0x7d8   :  { %309 = vrot.lane.b32.xlu2 %v307_v40, %s736_s27 }
 0x832   :  { %v310_v42 = vpop.permute.xlu2 %309 }
 0x833   :  { %v312_v43 = vadd.f32 %v310_v42, %v302_v41 }
 0x835   :  { %698 = vtanh.f32 %v312_v43 }
 0x83b   :  { %v699_v44 = vpop.eup %698 }
 0x83c   :  { %315 = vrot.lane.b32.xlu0 %v699_v44, %s735_s26 }
 0x8ae   :  { %v316_v45 = vpop.permute.xlu0 %315 }
 0x8af   :  { %v318_v46 = vmul.f32 %v316_v45, %v299_v39 }
 0x8b1   :  { %322 = vrot.lane.b32.xlu1 %v318_v46, %s736_s27 }
 0x923   :  { %v323_v47 = vpop.permute.xlu1 %322 }
 0x924   :  { %650 = vmatmul.msk.f32.vlgmr.msrb.gmra.mxu0 %vm43_vm0, %v323_v47 }
 0x9a1   :  { %v343_v49 = vpop.f32.mrf.mxu0 }
 0x9a2   :  { %v346_v50 = vadd.f32 %v649_v48, %v343_v49 }
 0x9a4   :  { %700 = vtanh.f32 %v346_v50  ;;  %v651_v52 = vmul.f32 -1.442695, %v346_v50 }
 0x9a6   :  { %702 = vpow2.f32 %v651_v52 }
 0x9aa   :  { %v701_v51 = vpop.eup %700 }
 0x9ab   :  { %369 = vrot.lane.b32.xlu2 %v701_v51, %s735_s26 }
 0x9ac   :  { %v703_v53 = vpop.eup %702 }
 0x9ad   :  { %v350_v54 = vadd.f32 1.0, %v703_v53 }
 0x9af   :  { %704 = vrcp.f32 %v350_v54  ;;  %v362_v60 = vand.u32 2147483648, %v350_v54  ;;  %vm356_vm5 = vweird.f32 %v350_v54  ;;  %v360_v61 = vand.u32 2147483647, %v350_v54 }
 0x9b1   :  { %v363_v63 = vor.u32 1.1754944e-38, %v362_v60  ;;  %vm361_vm7 = vcmp.eq.f32.partialorder %v360_v61, 8.507059e+37 }
 0x9b5   :  { %v705_v55 = vpop.eup %704 }
 0x9b6   :  { %v352_v56 = vmul.f32 %v705_v55, %v350_v54  ;;  %vm357_vm4 = vweird.f32 %v705_v55 }
 0x9b7   :  { %vm358_vm6 = vmor %vm356_vm5, %vm357_vm4 }
 0x9b8   :  { %v353_v57 = vsub.f32 1.0, %v352_v56 }
 0x9ba   :  { %v354_v58 = vmul.f32 %v705_v55, %v353_v57 }
 0x9bc   :  { %v355_v59 = vadd.f32 %v705_v55, %v354_v58 }
 0x9be   :  { %v359_v62 = vsel %vm358_vm6, %v705_v55, %v355_v59 }
 0x9bf   :  { %v364_v1 = vsel %vm361_vm7, %v363_v63, %v359_v62  ;;  %v658_v62 = vld [vmem:[%s868_s0 + $0x38] sm:$0xff]  ;;  %s737_s0 = smov 96  }
 0x9c0   :  { %v367_v3 = vmul.f32 %v364_v1, %v312_v43 }
 0xa05   :  { %v370_v0 = vpop.permute.xlu2 %369 }
 0xa06   :  { %v372_v2 = vmul.f32 %v370_v0, %v364_v1 }
 0xa08   :  { %374 = vrot.lane.b32.xlu0 %v372_v2, %s736_s27 }
 0xa7a   :  { %v375_v4 = vpop.permute.xlu0 %374 }
 0xa7b   :  { %v377_v5 = vadd.f32 %v375_v4, %v367_v3 }
 0xa7d   :  { %706 = vtanh.f32 %v377_v5 }
 0xa83   :  { %v707_v6 = vpop.eup %706 }
 0xa84   :  { %380 = vrot.lane.b32.xlu1 %v707_v6, %s735_s26 }
 0xaf6   :  { %v381_v7 = vpop.permute.xlu1 %380 }
 0xaf7   :  { %v383_v8 = vmul.f32 %v381_v7, %v364_v1 }
 0xaf9   :  { %387 = vrot.lane.b32.xlu2 %v383_v8, %s736_s27 }
 0xb53   :  { %v388_v9 = vpop.permute.xlu2 %387 }
 0xb54   :  { %653 = vmatmul.msk.f32.vlgmr.msrb.gmra.mxu1 %vm43_vm0, %v388_v9 }
 0xbd1   :  { %v408_v11 = vpop.f32.mrf.mxu1 }
 0xbd2   :  { %v411_v12 = vadd.f32 %v652_v10, %v408_v11 }
 0xbd4   :  { %708 = vtanh.f32 %v411_v12  ;;  %v654_v14 = vmul.f32 -1.442695, %v411_v12 }
 0xbd6   :  { %710 = vpow2.f32 %v654_v14 }
 0xbda   :  { %v709_v13 = vpop.eup %708 }
 0xbdb   :  { %434 = vrot.lane.b32.xlu0 %v709_v13, %s735_s26 }
 0xbdc   :  { %v711_v15 = vpop.eup %710 }
 0xbdd   :  { %v415_v16 = vadd.f32 1.0, %v711_v15 }
 0xbdf   :  { %712 = vrcp.f32 %v415_v16  ;;  %v427_v22 = vand.u32 2147483648, %v415_v16  ;;  %vm421_vm9 = vweird.f32 %v415_v16  ;;  %v425_v23 = vand.u32 2147483647, %v415_v16 }
 0xbe1   :  { %v428_v25 = vor.u32 1.1754944e-38, %v427_v22  ;;  %vm426_vm11 = vcmp.eq.f32.partialorder %v425_v23, 8.507059e+37  ;;  %v594_v22 = vld [vmem:[%s870_s2 + $0x10] sm:$0xff]  ;;  %v593_v23 = vld [vmem:[%s870_s2 + $0x8] sm:$0xff] }
 0xbe5   :  { %v713_v17 = vpop.eup %712 }
 0xbe6   :  { %v417_v18 = vmul.f32 %v713_v17, %v415_v16  ;;  %vm422_vm8 = vweird.f32 %v713_v17 }
 0xbe7   :  { %vm423_vm10 = vmor %vm421_vm9, %vm422_vm8 }
 0xbe8   :  { %v418_v19 = vsub.f32 1.0, %v417_v18 }
 0xbea   :  { %v419_v20 = vmul.f32 %v713_v17, %v418_v19 }
 0xbec   :  { %v420_v21 = vadd.f32 %v713_v17, %v419_v20 }
 0xbee   :  { %v424_v24 = vsel %vm423_vm10, %v713_v17, %v420_v21  ;;  %v595_v21 = vld [vmem:[%s870_s2 + $0x18] sm:$0xff] }
 0xbef   :  { %v429_v27 = vsel %vm426_vm11, %v428_v25, %v424_v24  ;;  %614 = vmatpush.msra.mxu0 %v595_v21  ;;  %v592_v24 = vld [vmem:[%s870_s2] sm:$0xff] }
 0xbf0   :  { %v432_v29 = vmul.f32 %v429_v27, %v377_v5 }
 0xbf1   :  { %615 = vmatpush.msra.mxu0 %v594_v22 }
 0xbf3   :  { %616 = vmatpush.msra.mxu0 %v593_v23 }
 0xbf5   :  { %617 = vmatpush.msra.mxu0 %v592_v24 }
 0xc4d   :  { %v435_v26 = vpop.permute.xlu0 %434 }
 0xc4e   :  { %v437_v28 = vmul.f32 %v435_v26, %v429_v27 }
 0xc50   :  { %439 = vrot.lane.b32.xlu1 %v437_v28, %s736_s27 }
 0xcc2   :  { %v440_v30 = vpop.permute.xlu1 %439 }
 0xcc3   :  { %v442_v31 = vadd.f32 %v440_v30, %v432_v29  ;;  %v667_v29 = vld [vmem:[%s871_s3] ss:$0 sm:$0xff] }
 0xcc5   :  { %714 = vtanh.f32 %v442_v31 }
 0xccb   :  { %v715_v32 = vpop.eup %714 }
 0xccc   :  { %445 = vrot.lane.b32.xlu2 %v715_v32, %s735_s26 }
 0xd26   :  { %v446_v33 = vpop.permute.xlu2 %445 }
 0xd27   :  { %v448_v34 = vmul.f32 %v446_v33, %v429_v27 }
 0xd29   :  { %452 = vrot.lane.b32.xlu0 %v448_v34, %s736_s27 }
 0xd9b   :  { %v453_v35 = vpop.permute.xlu0 %452 }
 0xd9c   :  { %656 = vmatmul.msk.f32.vlgmr.msrb.gmra.mxu2 %vm43_vm0, %v453_v35 }
 0xe1f   :  { %v473_v37 = vpop.f32.mrf.mxu2 }
 0xe20   :  { %v476_v38 = vadd.f32 %v655_v36, %v473_v37 }
 0xe22   :  { %716 = vtanh.f32 %v476_v38  ;;  %v657_v40 = vmul.f32 -1.442695, %v476_v38 }
 0xe24   :  { %718 = vpow2.f32 %v657_v40 }
 0xe28   :  { %v717_v39 = vpop.eup %716 }
 0xe29   :  { %499 = vrot.lane.b32.xlu1 %v717_v39, %s735_s26 }
 0xe2a   :  { %v719_v41 = vpop.eup %718 }
 0xe2b   :  { %v480_v42 = vadd.f32 1.0, %v719_v41 }
 0xe2d   :  { %720 = vrcp.f32 %v480_v42  ;;  %v492_v48 = vand.u32 2147483648, %v480_v42  ;;  %vm486_vm13 = vweird.f32 %v480_v42  ;;  %v490_v49 = vand.u32 2147483647, %v480_v42 }
 0xe2f   :  { %v493_v51 = vor.u32 1.1754944e-38, %v492_v48  ;;  %vm491_vm15 = vcmp.eq.f32.partialorder %v490_v49, 8.507059e+37 }
 0xe33   :  { %v721_v43 = vpop.eup %720 }
 0xe34   :  { %v482_v44 = vmul.f32 %v721_v43, %v480_v42  ;;  %vm487_vm12 = vweird.f32 %v721_v43 }
 0xe35   :  { %vm488_vm14 = vmor %vm486_vm13, %vm487_vm12 }
 0xe36   :  { %v483_v45 = vsub.f32 1.0, %v482_v44 }
 0xe38   :  { %v484_v46 = vmul.f32 %v721_v43, %v483_v45 }
 0xe3a   :  { %v485_v47 = vadd.f32 %v721_v43, %v484_v46 }
 0xe3c   :  { %v489_v50 = vsel %vm488_vm14, %v721_v43, %v485_v47 }
 0xe3d   :  { %v494_v53 = vsel %vm491_vm15, %v493_v51, %v489_v50 }
 0xe3e   :  { %v497_v55 = vmul.f32 %v494_v53, %v442_v31 }
 0xe9b   :  { %v500_v52 = vpop.permute.xlu1 %499 }
 0xe9c   :  { %v502_v54 = vmul.f32 %v500_v52, %v494_v53 }
 0xe9e   :  { %504 = vrot.lane.b32.xlu2 %v502_v54, %s736_s27 }
 0xef8   :  { %v505_v56 = vpop.permute.xlu2 %504 }
 0xef9   :  { %v507_v57 = vadd.f32 %v505_v56, %v497_v55 }
 0xefb   :  { %722 = vtanh.f32 %v507_v57 }
 0xf01   :  { %v723_v58 = vpop.eup %722 }
 0xf02   :  { %510 = vrot.lane.b32.xlu0 %v723_v58, %s735_s26 }
 0xf74   :  { %v511_v59 = vpop.permute.xlu0 %510 }
 0xf75   :  { %v513_v60 = vmul.f32 %v511_v59, %v494_v53 }
 0xf77   :  { %517 = vrot.lane.b32.xlu1 %v513_v60, %s736_s27 }
 0xfe9   :  { %v518_v61 = vpop.permute.xlu1 %517 }
 0xfea   :  { %659 = vmatmul.msk.f32.vlgmr.msrb.gmra.mxu3 %vm43_vm0, %v518_v61 }
0x106d   :  { %v538_v63 = vpop.f32.mrf.mxu3 }
0x106e   :  { %v541_v0 = vadd.f32 %v658_v62, %v538_v63 }
0x1070   :  { %724 = vtanh.f32 %v541_v0  ;;  %v660_v2 = vmul.f32 -1.442695, %v541_v0 }
0x1072   :  { %726 = vpow2.f32 %v660_v2 }
0x1076   :  { %v725_v1 = vpop.eup %724 }
0x1077   :  { %564 = vrot.lane.b32.xlu2 %v725_v1, %s735_s26 }
0x1078   :  { %v727_v3 = vpop.eup %726 }
0x1079   :  { %v545_v4 = vadd.f32 1.0, %v727_v3 }
0x107b   :  { %728 = vrcp.f32 %v545_v4  ;;  %v557_v10 = vand.u32 2147483648, %v545_v4  ;;  %vm551_vm3 = vweird.f32 %v545_v4  ;;  %v555_v11 = vand.u32 2147483647, %v545_v4 }
0x107d   :  { %v558_v13 = vor.u32 1.1754944e-38, %v557_v10  ;;  %vm556_vm5 = vcmp.eq.f32.partialorder %v555_v11, 8.507059e+37 }
0x1081   :  { %v729_v5 = vpop.eup %728 }
0x1082   :  { %v547_v6 = vmul.f32 %v729_v5, %v545_v4  ;;  %vm552_vm2 = vweird.f32 %v729_v5 }
0x1083   :  { %vm553_vm4 = vmor %vm551_vm3, %vm552_vm2 }
0x1084   :  { %v548_v7 = vsub.f32 1.0, %v547_v6 }
0x1086   :  { %v549_v8 = vmul.f32 %v729_v5, %v548_v7 }
0x1088   :  { %v550_v9 = vadd.f32 %v729_v5, %v549_v8 }
0x108a   :  { %v554_v12 = vsel %vm553_vm4, %v729_v5, %v550_v9 }
0x108b   :  { %v559_v15 = vsel %vm556_vm5, %v558_v13, %v554_v12 }
0x108c   :  { %v562_v17 = vmul.f32 %v559_v15, %v507_v57 }
0x10d1   :  { %v565_v14 = vpop.permute.xlu2 %564 }
0x10d2   :  { %v567_v16 = vmul.f32 %v565_v14, %v559_v15 }
0x10d4   :  { %569 = vrot.lane.b32.xlu0 %v567_v16, %s736_s27 }
0x1146   :  { %v570_v18 = vpop.permute.xlu0 %569 }
0x1147   :  { %v572_v19 = vadd.f32 %v570_v18, %v562_v17 }
0x1149   :  { %730 = vtanh.f32 %v572_v19  ;;  %585 = vrot.lane.b32.xlu0 %v572_v19, %s737_s0 }
0x114f   :  { %v731_v20 = vpop.eup %730 }
0x1150   :  { %575 = vrot.lane.b32.xlu1 %v731_v20, %s735_s26 }
0x11bb   :  { %v586_v25 = vpop.permute.xlu0 %585 }
0x11bc   :  { %588 = vst.msk [vmem:[#allocation4] sm:$0xff] %vm43_vm0, %v586_v25 }
0x11c2   :  { %v576_v26 = vpop.permute.xlu1 %575 }
0x11c3   :  { %v578_v27 = vmul.f32 %v576_v26, %v559_v15 }
0x11c5   :  { %580 = vrot.lane.b32.xlu2 %v578_v27, %s736_s27 }
0x121f   :  { %v581_v28 = vpop.permute.xlu2 %580 }
0x1220   :  { %583 = vst.msk [vmem:[#allocation3] sm:$0xff] %vm43_vm0, %v581_v28  ;;  %661 = vmatmul.msk.f32.vlgmr.msra.gmra.mxu0 %vm43_vm0, %v581_v28 }
0x129d   :  { %v619_v30 = vpop.f32.mrf.mxu0 }
0x129e   :  { %v620_v31 = vadd.f32 %v667_v29, %v619_v30 }
0x12a0   :  { %623 = vst.msk [vmem:[%s872_s4] sm:$0xff] %vm46_vm1, %v620_v31 }
0x12a1   :  { %628 = vsyncmov [#allocation5] }
0x12a4   :  { %s629_s26 = vpop.sfrf %628 }
0x12a5   :  { %p662_p0 = scmp.ne.s32.totalorder %s629_s26, 0 }
0x12a7   :  { %633 = shalt.err (%p662_p0)  }

// kernel: my_model_forward.2
= control target key start
LH: loop header
LB: loop body
LE: loop exit
PB: predicated region body
PF: predicated region fallthrough
CT: control target
= control target key end

     0   :  { %s1147_s0 = inlined_call_operand.vmem [shape: f32[8,8,128], index: 0, kind: input, shape index: {}]   ;;  %s1148_s1 = inlined_call_operand.vmem [shape: f32[32,128], index: 1, kind: input, shape index: {}]   ;;  %s1149_s2 = inlined_call_operand.vmem [shape: f32[32,128], index: 2, kind: input, shape index: {}]   ;;  %s1150_s3 = inlined_call_operand.vmem [shape: f32[1,128], index: 3, kind: input, shape index: {}]   ;;  %s1151_s4 = inlined_call_operand.vmem [shape: f32[8,8,128], index: 4, kind: output, shape index: {}]  }
   0x1   :  { %v928_v0 = vld [vmem:[%s1148_s1] sm:$0xff]  ;;  %v933_v1 = vld [vmem:[%s1148_s1 + $0x8] sm:$0xff]  ;;  %v938_v2 = vld [vmem:[%s1148_s1 + $0x10] sm:$0xff] }
   0x2   :  { %v943_v3 = vld [vmem:[%s1148_s1 + $0x18] sm:$0xff] }
   0x3   :  { %42 = vsyncadd [#allocation5], 512  ;;  %vm43_vm0 = vcmask 261120   ;;  %v896_v4 = vmov 0.0  }
   0x4   :  { %44 = vst.msk [vmem:[#allocation3] sm:$0xff] %vm43_vm0, %v896_v4 }
   0x5   :  { %45 = vst.msk [vmem:[#allocation4] sm:$0xff] %vm43_vm0, %v896_v4 }
   0x6   :  { %894 = dma.done.wait [#allocation5], 512 }
   0x7   :  { %895 = vsyncadd [#allocation5], 4294966784  ;;  %77 = vmatpush.msra.mxu0 %v943_v3  ;;  %170 = vmatpush.msra.mxu2 %v943_v3  ;;  %v60_v6 = vld [vmem:[%s1147_s0] sm:$0xff]  ;;  %s897_s24 = smov 64   ;;  %s898_s25 = smov 32   ;;  %v981_v31 = vld [vmem:[%s1149_s2 + $0x18] sm:$0xff] }
   0x8   :  { %v986_v32 = vld [vmem:[%s1149_s2 + $0x10] sm:$0xff]  ;;  %147 = vmatpush.msra.mxu1 %v981_v31  ;;  %233 = vmatpush.msra.mxu3 %v981_v31  ;;  %v993_v33 = vld [vmem:[%s1149_s2 + $0x8] sm:$0xff]  ;;  %v1003_v36 = vld [vmem:[%s1149_s2] sm:$0xff] }
   0x9   :  { %78 = vmatpush.msra.mxu0 %v938_v2  ;;  %171 = vmatpush.msra.mxu2 %v938_v2  ;;  %v1028_v38 = vld [vmem:[%s1150_s3] ss:$0 sm:$0xff]  ;;  %v789_v41 = vld [vmem:[%s1147_s0 + $0x8] sm:$0xff] }
   0xa   :  { %148 = vmatpush.msra.mxu1 %v986_v32  ;;  %234 = vmatpush.msra.mxu3 %v986_v32 }
   0xb   :  { %79 = vmatpush.msra.mxu0 %v933_v1  ;;  %172 = vmatpush.msra.mxu2 %v933_v1  ;;  %v58_v5 = vld [vmem:[#allocation3] sm:$0xff] }
   0xc   :  { %v59_v10 = vld [vmem:[#allocation4] sm:$0xff]  ;;  %149 = vmatpush.msra.mxu1 %v993_v33  ;;  %235 = vmatpush.msra.mxu3 %v993_v33 }
   0xd   :  { %80 = vmatpush.msra.mxu0 %v928_v0  ;;  %173 = vmatpush.msra.mxu2 %v928_v0 }
   0xe   :  { %786 = vmatmul.msk.f32.vlgmr.msra.gmra.mxu0 %vm43_vm0, %v58_v5  ;;  %150 = vmatpush.msra.mxu1 %v1003_v36 }
   0xf   :  { %257 = vmatpush.msrb.mxu0 %v943_v3  ;;  %344 = vmatpush.msrb.mxu2 %v943_v3 }
  0x10   :  { %236 = vmatpush.msra.mxu3 %v1003_v36  ;;  %320 = vmatpush.msrb.mxu1 %v981_v31 }
  0x11   :  { %258 = vmatpush.msrb.mxu0 %v938_v2  ;;  %345 = vmatpush.msrb.mxu2 %v938_v2 }
  0x12   :  { %407 = vmatpush.msrb.mxu3 %v981_v31  ;;  %321 = vmatpush.msrb.mxu1 %v986_v32 }
  0x13   :  { %259 = vmatpush.msrb.mxu0 %v933_v1  ;;  %346 = vmatpush.msrb.mxu2 %v933_v1 }
  0x14   :  { %408 = vmatpush.msrb.mxu3 %v986_v32  ;;  %322 = vmatpush.msrb.mxu1 %v993_v33 }
  0x15   :  { %260 = vmatpush.msrb.mxu0 %v928_v0  ;;  %347 = vmatpush.msrb.mxu2 %v928_v0 }
  0x16   :  { %409 = vmatpush.msrb.mxu3 %v993_v33  ;;  %323 = vmatpush.msrb.mxu1 %v1003_v36 }
  0x17   :  { %431 = vmatpush.msra.mxu0 %v943_v3 }
  0x18   :  { %410 = vmatpush.msrb.mxu3 %v1003_v36 }
  0x19   :  { %432 = vmatpush.msra.mxu0 %v938_v2 }
  0x1b   :  { %433 = vmatpush.msra.mxu0 %v933_v1 }
  0x1d   :  { %434 = vmatpush.msra.mxu0 %v928_v0 }
  0x8b   :  { %v82_v7 = vpop.f32.mrf.mxu0 }
  0x8c   :  { %v85_v8 = vadd.f32 %v82_v7, %v60_v6  ;;  %v794_v7 = vld [vmem:[%s1147_s0 + $0x10] sm:$0xff] }
  0x8e   :  { %830 = vtanh.f32 %v85_v8  ;;  %v787_v11 = vmul.f32 -1.442695, %v85_v8 }
  0x90   :  { %832 = vpow2.f32 %v787_v11 }
  0x94   :  { %v831_v9 = vpop.eup %830 }
  0x95   :  { %112 = vrot.lane.b32.xlu0 %v831_v9, %s897_s24 }
  0x96   :  { %v833_v12 = vpop.eup %832 }
  0x97   :  { %v89_v13 = vadd.f32 1.0, %v833_v12 }
  0x99   :  { %834 = vrcp.f32 %v89_v13  ;;  %v101_v19 = vand.u32 2147483648, %v89_v13  ;;  %vm95_vm2 = vweird.f32 %v89_v13  ;;  %v99_v20 = vand.u32 2147483647, %v89_v13 }
  0x9b   :  { %v102_v22 = vor.u32 1.1754944e-38, %v101_v19  ;;  %vm100_vm4 = vcmp.eq.f32.partialorder %v99_v20, 8.507059e+37 }
  0x9d   :  { %107 = vrot.lane.b32.xlu0 %v59_v10, %s898_s25 }
  0x9f   :  { %v835_v14 = vpop.eup %834 }
  0xa0   :  { %v91_v15 = vmul.f32 %v835_v14, %v89_v13  ;;  %vm96_vm1 = vweird.f32 %v835_v14 }
  0xa1   :  { %vm97_vm3 = vmor %vm95_vm2, %vm96_vm1 }
  0xa2   :  { %v92_v16 = vsub.f32 1.0, %v91_v15 }
  0xa4   :  { %v93_v17 = vmul.f32 %v835_v14, %v92_v16 }
  0xa6   :  { %v94_v18 = vadd.f32 %v835_v14, %v93_v17 }
  0xa8   :  { %v98_v21 = vsel %vm97_vm3, %v835_v14, %v94_v18 }
  0xa9   :  { %v103_v24 = vsel %vm100_vm4, %v102_v22, %v98_v21 }
 0x107   :  { %v113_v23 = vpop.permute.xlu0 %112 }
 0x108   :  { %v115_v25 = vmul.f32 %v113_v23, %v103_v24 }
 0x10a   :  { %117 = vrot.lane.b32.xlu1 %v115_v25, %s898_s25 }
 0x10f   :  { %v108_v26 = vpop.permute.xlu0 %107 }
 0x110   :  { %v110_v27 = vmul.f32 %v108_v26, %v103_v24 }
 0x17c   :  { %v118_v28 = vpop.permute.xlu1 %117 }
 0x17d   :  { %v974_v29 = vadd.f32 %v118_v28, %v110_v27 }
 0x17f   :  { %836 = vtanh.f32 %v974_v29 }
 0x185   :  { %v837_v30 = vpop.eup %836 }
 0x186   :  { %123 = vrot.lane.b32.xlu1 %v837_v30, %s897_s24 }
 0x1f8   :  { %v124_v34 = vpop.permute.xlu1 %123 }
 0x1f9   :  { %v126_v35 = vmul.f32 %v124_v34, %v103_v24 }
 0x1fb   :  { %131 = vrot.lane.b32.xlu2 %v126_v35, %s898_s25 }
 0x255   :  { %v132_v37 = vpop.permute.xlu2 %131 }
 0x256   :  { %788 = vmatmul.msk.f32.vlgmr.msra.gmra.mxu1 %vm43_vm0, %v132_v37  ;;  %790 = vmatmul.msk.f32.vlgmr.msra.gmra.mxu2 %vm43_vm0, %v132_v37 }
 0x257   :  { %518 = vmatpush.msra.mxu2 %v943_v3  ;;  %494 = vmatpush.msra.mxu1 %v981_v31 }
 0x259   :  { %519 = vmatpush.msra.mxu2 %v938_v2  ;;  %495 = vmatpush.msra.mxu1 %v986_v32 }
 0x25b   :  { %520 = vmatpush.msra.mxu2 %v933_v1  ;;  %496 = vmatpush.msra.mxu1 %v993_v33 }
 0x25d   :  { %521 = vmatpush.msra.mxu2 %v928_v0  ;;  %497 = vmatpush.msra.mxu1 %v1003_v36 }
 0x2d3   :  { %v152_v39 = vpop.f32.mrf.mxu1 }
 0x2d4   :  { %v153_v40 = vadd.f32 %v1028_v38, %v152_v39 }
 0x2d6   :  { %155 = vst [vmem:[%s1151_s4] sm:$0xff] %v153_v40 }
 0x2d9   :  { %v175_v42 = vpop.f32.mrf.mxu2 }
 0x2da   :  { %v178_v43 = vadd.f32 %v789_v41, %v175_v42 }
 0x2dc   :  { %838 = vtanh.f32 %v178_v43  ;;  %v791_v45 = vmul.f32 -1.442695, %v178_v43 }
 0x2de   :  { %840 = vpow2.f32 %v791_v45 }
 0x2e2   :  { %v839_v44 = vpop.eup %838 }
 0x2e3   :  { %201 = vrot.lane.b32.xlu2 %v839_v44, %s897_s24 }
 0x2e4   :  { %v841_v46 = vpop.eup %840 }
 0x2e5   :  { %v182_v47 = vadd.f32 1.0, %v841_v46 }
 0x2e7   :  { %842 = vrcp.f32 %v182_v47  ;;  %v194_v53 = vand.u32 2147483648, %v182_v47  ;;  %vm188_vm6 = vweird.f32 %v182_v47  ;;  %v192_v54 = vand.u32 2147483647, %v182_v47 }
 0x2e9   :  { %v195_v56 = vor.u32 1.1754944e-38, %v194_v53  ;;  %vm193_vm8 = vcmp.eq.f32.partialorder %v192_v54, 8.507059e+37 }
 0x2ed   :  { %v843_v48 = vpop.eup %842 }
 0x2ee   :  { %v184_v49 = vmul.f32 %v843_v48, %v182_v47  ;;  %vm189_vm5 = vweird.f32 %v843_v48 }
 0x2ef   :  { %vm190_vm7 = vmor %vm188_vm6, %vm189_vm5 }
 0x2f0   :  { %v185_v50 = vsub.f32 1.0, %v184_v49 }
 0x2f2   :  { %v186_v51 = vmul.f32 %v843_v48, %v185_v50 }
 0x2f4   :  { %v187_v52 = vadd.f32 %v843_v48, %v186_v51 }
 0x2f6   :  { %v191_v55 = vsel %vm190_vm7, %v843_v48, %v187_v52 }
 0x2f7   :  { %v196_v58 = vsel %vm193_vm8, %v195_v56, %v191_v55 }
 0x2f8   :  { %v199_v60 = vmul.f32 %v196_v58, %v974_v29 }
 0x33d   :  { %v202_v57 = vpop.permute.xlu2 %201 }
 0x33e   :  { %v204_v59 = vmul.f32 %v202_v57, %v196_v58 }
 0x340   :  { %206 = vrot.lane.b32.xlu0 %v204_v59, %s898_s25 }
 0x3b2   :  { %v207_v61 = vpop.permute.xlu0 %206 }
 0x3b3   :  { %v209_v62 = vadd.f32 %v207_v61, %v199_v60 }
 0x3b5   :  { %844 = vtanh.f32 %v209_v62 }
 0x3bb   :  { %v845_v63 = vpop.eup %844 }
 0x3bc   :  { %212 = vrot.lane.b32.xlu1 %v845_v63, %s897_s24 }
 0x42e   :  { %v213_v4 = vpop.permute.xlu1 %212 }
 0x42f   :  { %v215_v5 = vmul.f32 %v213_v4, %v196_v58  ;;  %v804_v4 = vld [vmem:[%s1147_s0 + $0x20] sm:$0xff] }
 0x431   :  { %217 = vrot.lane.b32.xlu2 %v215_v5, %s898_s25 }
 0x48b   :  { %v218_v6 = vpop.permute.xlu2 %217 }
 0x48c   :  { %792 = vmatmul.msk.f32.vlgmr.msra.gmra.mxu3 %vm43_vm0, %v218_v6  ;;  %795 = vmatmul.msk.f32.vlgmr.msrb.gmra.mxu0 %vm43_vm0, %v218_v6 }
 0x48d   :  { %605 = vmatpush.msrb.mxu0 %v943_v3  ;;  %581 = vmatpush.msra.mxu3 %v981_v31 }
 0x48f   :  { %606 = vmatpush.msrb.mxu0 %v938_v2  ;;  %582 = vmatpush.msra.mxu3 %v986_v32 }
 0x491   :  { %607 = vmatpush.msrb.mxu0 %v933_v1  ;;  %583 = vmatpush.msra.mxu3 %v993_v33 }
 0x493   :  { %608 = vmatpush.msrb.mxu0 %v928_v0  ;;  %584 = vmatpush.msra.mxu3 %v1003_v36 }
 0x509   :  { %v262_v8 = vpop.f32.mrf.mxu0 }
 0x50a   :  { %v265_v9 = vadd.f32 %v794_v7, %v262_v8 }
 0x50c   :  { %846 = vtanh.f32 %v265_v9  ;;  %v796_v13 = vmul.f32 -1.442695, %v265_v9 }
 0x50e   :  { %848 = vpow2.f32 %v796_v13 }
 0x50f   :  { %v238_v10 = vpop.f32.mrf.mxu3 }
 0x510   :  { %v239_v11 = vadd.f32 %v1028_v38, %v238_v10 }
 0x512   :  { %v847_v12 = vpop.eup %846  ;;  %793 = vst [vmem:[%s1151_s4 + $0x8] sm:$0xff] %v239_v11 }
 0x513   :  { %288 = vrot.lane.b32.xlu0 %v847_v12, %s897_s24 }
 0x514   :  { %v849_v14 = vpop.eup %848 }
 0x515   :  { %v269_v15 = vadd.f32 1.0, %v849_v14 }
 0x517   :  { %850 = vrcp.f32 %v269_v15  ;;  %v281_v21 = vand.u32 2147483648, %v269_v15  ;;  %vm275_vm10 = vweird.f32 %v269_v15  ;;  %v279_v22 = vand.u32 2147483647, %v269_v15 }
 0x519   :  { %v282_v24 = vor.u32 1.1754944e-38, %v281_v21  ;;  %vm280_vm12 = vcmp.eq.f32.partialorder %v279_v22, 8.507059e+37 }
 0x51d   :  { %v851_v16 = vpop.eup %850 }
 0x51e   :  { %v271_v17 = vmul.f32 %v851_v16, %v269_v15  ;;  %vm276_vm9 = vweird.f32 %v851_v16 }
 0x51f   :  { %vm277_vm11 = vmor %vm275_vm10, %vm276_vm9 }
 0x520   :  { %v272_v18 = vsub.f32 1.0, %v271_v17 }
 0x522   :  { %v273_v19 = vmul.f32 %v851_v16, %v272_v18 }
 0x524   :  { %v274_v20 = vadd.f32 %v851_v16, %v273_v19 }
 0x526   :  { %v278_v23 = vsel %vm277_vm11, %v851_v16, %v274_v20 }
 0x527   :  { %v283_v26 = vsel %vm280_vm12, %v282_v24, %v278_v23 }
 0x528   :  { %v286_v28 = vmul.f32 %v283_v26, %v209_v62 }
 0x585   :  { %v289_v25 = vpop.permute.xlu0 %288 }
 0x586   :  { %v291_v27 = vmul.f32 %v289_v25, %v283_v26 }
 0x588   :  { %293 = vrot.lane.b32.xlu1 %v291_v27, %s898_s25 }
 0x5fa   :  { %v294_v29 = vpop.permute.xlu1 %293 }
 0x5fb   :  { %v296_v30 = vadd.f32 %v294_v29, %v286_v28 }
 0x5fd   :  { %852 = vtanh.f32 %v296_v30 }
 0x603   :  { %v853_v34 = vpop.eup %852 }
 0x604   :  { %299 = vrot.lane.b32.xlu2 %v853_v34, %s897_s24 }
 0x65e   :  { %v300_v35 = vpop.permute.xlu2 %299 }
 0x65f   :  { %v302_v37 = vmul.f32 %v300_v35, %v283_v26 }
 0x661   :  { %304 = vrot.lane.b32.xlu0 %v302_v37, %s898_s25 }
 0x6d3   :  { %v305_v39 = vpop.permute.xlu0 %304 }
 0x6d4   :  { %797 = vmatmul.msk.f32.vlgmr.msrb.gmra.mxu1 %vm43_vm0, %v305_v39  ;;  %800 = vmatmul.msk.f32.vlgmr.msrb.gmra.mxu2 %vm43_vm0, %v305_v39 }
 0x6d5   :  { %692 = vmatpush.msrb.mxu2 %v943_v3  ;;  %668 = vmatpush.msrb.mxu1 %v981_v31 }
 0x6d7   :  { %693 = vmatpush.msrb.mxu2 %v938_v2  ;;  %669 = vmatpush.msrb.mxu1 %v986_v32  ;;  %v799_v2 = vld [vmem:[%s1147_s0 + $0x18] sm:$0xff] }
 0x6d9   :  { %694 = vmatpush.msrb.mxu2 %v933_v1  ;;  %670 = vmatpush.msrb.mxu1 %v993_v33 }
 0x6db   :  { %695 = vmatpush.msrb.mxu2 %v928_v0  ;;  %671 = vmatpush.msrb.mxu1 %v1003_v36 }
 0x751   :  { %v325_v40 = vpop.f32.mrf.mxu1 }
 0x752   :  { %v326_v41 = vadd.f32 %v1028_v38, %v325_v40 }
 0x754   :  { %798 = vst [vmem:[%s1151_s4 + $0x10] sm:$0xff] %v326_v41 }
 0x757   :  { %v349_v3 = vpop.f32.mrf.mxu2 }
 0x758   :  { %v352_v42 = vadd.f32 %v799_v2, %v349_v3 }
 0x75a   :  { %854 = vtanh.f32 %v352_v42  ;;  %v801_v0 = vmul.f32 -1.442695, %v352_v42 }
 0x75c   :  { %856 = vpow2.f32 %v801_v0 }
 0x760   :  { %v855_v1 = vpop.eup %854 }
 0x761   :  { %375 = vrot.lane.b32.xlu1 %v855_v1, %s897_s24 }
 0x762   :  { %v857_v43 = vpop.eup %856 }
 0x763   :  { %v356_v44 = vadd.f32 1.0, %v857_v43 }
 0x765   :  { %858 = vrcp.f32 %v356_v44  ;;  %v368_v50 = vand.u32 2147483648, %v356_v44  ;;  %vm362_vm14 = vweird.f32 %v356_v44  ;;  %v366_v51 = vand.u32 2147483647, %v356_v44 }
 0x767   :  { %v369_v53 = vor.u32 1.1754944e-38, %v368_v50  ;;  %vm367_vm1 = vcmp.eq.f32.partialorder %v366_v51, 8.507059e+37 }
 0x76b   :  { %v859_v45 = vpop.eup %858 }
 0x76c   :  { %v358_v46 = vmul.f32 %v859_v45, %v356_v44  ;;  %vm363_vm13 = vweird.f32 %v859_v45 }
 0x76d   :  { %vm364_vm15 = vmor %vm362_vm14, %vm363_vm13 }
 0x76e   :  { %v359_v47 = vsub.f32 1.0, %v358_v46 }
 0x770   :  { %v360_v48 = vmul.f32 %v859_v45, %v359_v47 }
 0x772   :  { %v361_v49 = vadd.f32 %v859_v45, %v360_v48 }
 0x774   :  { %v365_v52 = vsel %vm364_vm15, %v859_v45, %v361_v49 }
 0x775   :  { %v370_v55 = vsel %vm367_vm1, %v369_v53, %v365_v52 }
 0x776   :  { %v373_v57 = vmul.f32 %v370_v55, %v296_v30  ;;  %v809_v30 = vld [vmem:[%s1147_s0 + $0x28] sm:$0xff] }
 0x7d3   :  { %v376_v54 = vpop.permute.xlu1 %375 }
 0x7d4   :  { %v378_v56 = vmul.f32 %v376_v54, %v370_v55 }
 0x7d6   :  { %380 = vrot.lane.b32.xlu2 %v378_v56, %s898_s25 }
 0x830   :  { %v381_v58 = vpop.permute.xlu2 %380 }
 0x831   :  { %v383_v59 = vadd.f32 %v381_v58, %v373_v57  ;;  %v814_v57 = vld [vmem:[%s1147_s0 + $0x30] sm:$0xff] }
 0x833   :  { %860 = vtanh.f32 %v383_v59 }
 0x839   :  { %v861_v60 = vpop.eup %860 }
 0x83a   :  { %386 = vrot.lane.b32.xlu0 %v861_v60, %s897_s24 }
 0x8ac   :  { %v387_v61 = vpop.permute.xlu0 %386 }
 0x8ad   :  { %v389_v62 = vmul.f32 %v387_v61, %v370_v55 }
 0x8af   :  { %391 = vrot.lane.b32.xlu1 %v389_v62, %s898_s25 }
 0x921   :  { %v392_v63 = vpop.permute.xlu1 %391 }
 0x922   :  { %802 = vmatmul.msk.f32.vlgmr.msrb.gmra.mxu3 %vm43_vm0, %v392_v63  ;;  %805 = vmatmul.msk.f32.vlgmr.msra.gmra.mxu0 %vm43_vm0, %v392_v63 }
 0x923   :  { %755 = vmatpush.msrb.mxu3 %v981_v31 }
 0x925   :  { %756 = vmatpush.msrb.mxu3 %v986_v32 }
 0x927   :  { %757 = vmatpush.msrb.mxu3 %v993_v33 }
 0x929   :  { %758 = vmatpush.msrb.mxu3 %v1003_v36 }
 0x99f   :  { %v436_v5 = vpop.f32.mrf.mxu0 }
 0x9a0   :  { %v439_v6 = vadd.f32 %v804_v4, %v436_v5 }
 0x9a2   :  { %862 = vtanh.f32 %v439_v6  ;;  %v806_v31 = vmul.f32 -1.442695, %v439_v6 }
 0x9a4   :  { %864 = vpow2.f32 %v806_v31 }
 0x9a5   :  { %v412_v7 = vpop.f32.mrf.mxu3 }
 0x9a6   :  { %v413_v8 = vadd.f32 %v1028_v38, %v412_v7 }
 0x9a8   :  { %v863_v9 = vpop.eup %862  ;;  %803 = vst [vmem:[%s1151_s4 + $0x18] sm:$0xff] %v413_v8 }
 0x9a9   :  { %462 = vrot.lane.b32.xlu2 %v863_v9, %s897_s24 }
 0x9aa   :  { %v865_v32 = vpop.eup %864 }
 0x9ab   :  { %v443_v33 = vadd.f32 1.0, %v865_v32 }
 0x9ad   :  { %866 = vrcp.f32 %v443_v33  ;;  %v455_v14 = vand.u32 2147483648, %v443_v33  ;;  %vm449_vm3 = vweird.f32 %v443_v33  ;;  %v453_v15 = vand.u32 2147483647, %v443_v33 }
 0x9af   :  { %v456_v17 = vor.u32 1.1754944e-38, %v455_v14  ;;  %vm454_vm5 = vcmp.eq.f32.partialorder %v453_v15, 8.507059e+37 }
 0x9b3   :  { %v867_v36 = vpop.eup %866 }
 0x9b4   :  { %v445_v10 = vmul.f32 %v867_v36, %v443_v33  ;;  %vm450_vm2 = vweird.f32 %v867_v36 }
 0x9b5   :  { %vm451_vm4 = vmor %vm449_vm3, %vm450_vm2 }
 0x9b6   :  { %v446_v11 = vsub.f32 1.0, %v445_v10 }
 0x9b8   :  { %v447_v12 = vmul.f32 %v867_v36, %v446_v11 }
 0x9ba   :  { %v448_v13 = vadd.f32 %v867_v36, %v447_v12 }
 0x9bc   :  { %v452_v16 = vsel %vm451_vm4, %v867_v36, %v448_v13 }
 0x9bd   :  { %v457_v19 = vsel %vm454_vm5, %v456_v17, %v452_v16 }
 0x9be   :  { %v460_v21 = vmul.f32 %v457_v19, %v383_v59 }
 0xa03   :  { %v463_v18 = vpop.permute.xlu2 %462 }
 0xa04   :  { %v465_v20 = vmul.f32 %v463_v18, %v457_v19 }
 0xa06   :  { %467 = vrot.lane.b32.xlu0 %v465_v20, %s898_s25 }
 0xa78   :  { %v468_v22 = vpop.permute.xlu0 %467 }
 0xa79   :  { %v470_v23 = vadd.f32 %v468_v22, %v460_v21 }
 0xa7b   :  { %868 = vtanh.f32 %v470_v23 }
 0xa81   :  { %v869_v24 = vpop.eup %868 }
 0xa82   :  { %473 = vrot.lane.b32.xlu1 %v869_v24, %s897_s24 }
 0xaf4   :  { %v474_v25 = vpop.permute.xlu1 %473 }
 0xaf5   :  { %v476_v26 = vmul.f32 %v474_v25, %v457_v19 }
 0xaf7   :  { %478 = vrot.lane.b32.xlu2 %v476_v26, %s898_s25 }
 0xb51   :  { %v479_v27 = vpop.permute.xlu2 %478 }
 0xb52   :  { %807 = vmatmul.msk.f32.vlgmr.msra.gmra.mxu1 %vm43_vm0, %v479_v27  ;;  %810 = vmatmul.msk.f32.vlgmr.msra.gmra.mxu2 %vm43_vm0, %v479_v27 }
 0xbcf   :  { %v499_v28 = vpop.f32.mrf.mxu1 }
 0xbd0   :  { %v500_v29 = vadd.f32 %v1028_v38, %v499_v28 }
 0xbd2   :  { %808 = vst [vmem:[%s1151_s4 + $0x20] sm:$0xff] %v500_v29 }
 0xbd5   :  { %v523_v34 = vpop.f32.mrf.mxu2 }
 0xbd6   :  { %v526_v35 = vadd.f32 %v809_v30, %v523_v34 }
 0xbd8   :  { %870 = vtanh.f32 %v526_v35  ;;  %v811_v39 = vmul.f32 -1.442695, %v526_v35 }
 0xbda   :  { %872 = vpow2.f32 %v811_v39 }
 0xbde   :  { %v871_v37 = vpop.eup %870 }
 0xbdf   :  { %549 = vrot.lane.b32.xlu0 %v871_v37, %s897_s24 }
 0xbe0   :  { %v873_v40 = vpop.eup %872 }
 0xbe1   :  { %v530_v41 = vadd.f32 1.0, %v873_v40 }
 0xbe3   :  { %874 = vrcp.f32 %v530_v41  ;;  %v542_v43 = vand.u32 2147483648, %v530_v41  ;;  %vm536_vm7 = vweird.f32 %v530_v41  ;;  %v540_v44 = vand.u32 2147483647, %v530_v41 }
 0xbe5   :  { %v543_v46 = vor.u32 1.1754944e-38, %v542_v43  ;;  %vm541_vm9 = vcmp.eq.f32.partialorder %v540_v44, 8.507059e+37 }
 0xbe9   :  { %v875_v2 = vpop.eup %874 }
 0xbea   :  { %v532_v3 = vmul.f32 %v875_v2, %v530_v41  ;;  %vm537_vm6 = vweird.f32 %v875_v2 }
 0xbeb   :  { %vm538_vm8 = vmor %vm536_vm7, %vm537_vm6 }
 0xbec   :  { %v533_v42 = vsub.f32 1.0, %v532_v3 }
 0xbee   :  { %v534_v1 = vmul.f32 %v875_v2, %v533_v42 }
 0xbf0   :  { %v535_v0 = vadd.f32 %v875_v2, %v534_v1 }
 0xbf2   :  { %v539_v45 = vsel %vm538_vm8, %v875_v2, %v535_v0 }
 0xbf3   :  { %v544_v48 = vsel %vm541_vm9, %v543_v46, %v539_v45 }
 0xbf4   :  { %v547_v50 = vmul.f32 %v544_v48, %v470_v23  ;;  %v819_v23 = vld [vmem:[%s1147_s0 + $0x38] sm:$0xff]  ;;  %s899_s0 = smov 96  }
 0xc51   :  { %v550_v47 = vpop.permute.xlu0 %549 }
 0xc52   :  { %v552_v49 = vmul.f32 %v550_v47, %v544_v48 }
 0xc54   :  { %554 = vrot.lane.b32.xlu1 %v552_v49, %s898_s25 }
 0xcc6   :  { %v555_v51 = vpop.permute.xlu1 %554 }
 0xcc7   :  { %v557_v52 = vadd.f32 %v555_v51, %v547_v50 }
 0xcc9   :  { %876 = vtanh.f32 %v557_v52 }
 0xccf   :  { %v877_v53 = vpop.eup %876 }
 0xcd0   :  { %560 = vrot.lane.b32.xlu2 %v877_v53, %s897_s24 }
 0xd2a   :  { %v561_v54 = vpop.permute.xlu2 %560 }
 0xd2b   :  { %v563_v55 = vmul.f32 %v561_v54, %v544_v48 }
 0xd2d   :  { %565 = vrot.lane.b32.xlu0 %v563_v55, %s898_s25 }
 0xd9f   :  { %v566_v56 = vpop.permute.xlu0 %565 }
 0xda0   :  { %812 = vmatmul.msk.f32.vlgmr.msra.gmra.mxu3 %vm43_vm0, %v566_v56  ;;  %815 = vmatmul.msk.f32.vlgmr.msrb.gmra.mxu0 %vm43_vm0, %v566_v56 }
 0xe1d   :  { %v610_v58 = vpop.f32.mrf.mxu0 }
 0xe1e   :  { %v613_v59 = vadd.f32 %v814_v57, %v610_v58 }
 0xe20   :  { %878 = vtanh.f32 %v613_v59  ;;  %v816_v63 = vmul.f32 -1.442695, %v613_v59 }
 0xe22   :  { %880 = vpow2.f32 %v816_v63 }
 0xe23   :  { %v586_v60 = vpop.f32.mrf.mxu3 }
 0xe24   :  { %v587_v61 = vadd.f32 %v1028_v38, %v586_v60 }
 0xe26   :  { %v879_v62 = vpop.eup %878  ;;  %813 = vst [vmem:[%s1151_s4 + $0x28] sm:$0xff] %v587_v61 }
 0xe27   :  { %636 = vrot.lane.b32.xlu1 %v879_v62, %s897_s24 }
 0xe28   :  { %v881_v4 = vpop.eup %880 }
 0xe29   :  { %v617_v5 = vadd.f32 1.0, %v881_v4 }
 0xe2b   :  { %882 = vrcp.f32 %v617_v5  ;;  %v629_v32 = vand.u32 2147483648, %v617_v5  ;;  %vm623_vm11 = vweird.f32 %v617_v5  ;;  %v627_v33 = vand.u32 2147483647, %v617_v5 }
 0xe2d   :  { %v630_v10 = vor.u32 1.1754944e-38, %v629_v32  ;;  %vm628_vm13 = vcmp.eq.f32.partialorder %v627_v33, 8.507059e+37 }
 0xe31   :  { %v883_v6 = vpop.eup %882 }
 0xe32   :  { %v619_v7 = vmul.f32 %v883_v6, %v617_v5  ;;  %vm624_vm10 = vweird.f32 %v883_v6 }
 0xe33   :  { %vm625_vm12 = vmor %vm623_vm11, %vm624_vm10 }
 0xe34   :  { %v620_v8 = vsub.f32 1.0, %v619_v7 }
 0xe36   :  { %v621_v9 = vmul.f32 %v883_v6, %v620_v8 }
 0xe38   :  { %v622_v31 = vadd.f32 %v883_v6, %v621_v9 }
 0xe3a   :  { %v626_v36 = vsel %vm625_vm12, %v883_v6, %v622_v31 }
 0xe3b   :  { %v631_v12 = vsel %vm628_vm13, %v630_v10, %v626_v36 }
 0xe3c   :  { %v634_v14 = vmul.f32 %v631_v12, %v557_v52 }
 0xe99   :  { %v637_v11 = vpop.permute.xlu1 %636 }
 0xe9a   :  { %v639_v13 = vmul.f32 %v637_v11, %v631_v12 }
 0xe9c   :  { %641 = vrot.lane.b32.xlu2 %v639_v13, %s898_s25 }
 0xef6   :  { %v642_v15 = vpop.permute.xlu2 %641 }
 0xef7   :  { %v644_v16 = vadd.f32 %v642_v15, %v634_v14 }
 0xef9   :  { %884 = vtanh.f32 %v644_v16 }
 0xeff   :  { %v885_v17 = vpop.eup %884 }
 0xf00   :  { %647 = vrot.lane.b32.xlu0 %v885_v17, %s897_s24 }
 0xf72   :  { %v648_v18 = vpop.permute.xlu0 %647 }
 0xf73   :  { %v650_v19 = vmul.f32 %v648_v18, %v631_v12 }
 0xf75   :  { %652 = vrot.lane.b32.xlu1 %v650_v19, %s898_s25 }
 0xfe7   :  { %v653_v20 = vpop.permute.xlu1 %652 }
 0xfe8   :  { %817 = vmatmul.msk.f32.vlgmr.msrb.gmra.mxu1 %vm43_vm0, %v653_v20  ;;  %820 = vmatmul.msk.f32.vlgmr.msrb.gmra.mxu2 %vm43_vm0, %v653_v20 }
0x1065   :  { %v673_v21 = vpop.f32.mrf.mxu1 }
0x1066   :  { %v674_v22 = vadd.f32 %v1028_v38, %v673_v21 }
0x1068   :  { %818 = vst [vmem:[%s1151_s4 + $0x30] sm:$0xff] %v674_v22 }
0x106b   :  { %v697_v24 = vpop.f32.mrf.mxu2 }
0x106c   :  { %v700_v25 = vadd.f32 %v819_v23, %v697_v24 }
0x106e   :  { %886 = vtanh.f32 %v700_v25  ;;  %v821_v27 = vmul.f32 -1.442695, %v700_v25 }
0x1070   :  { %888 = vpow2.f32 %v821_v27 }
0x1074   :  { %v887_v26 = vpop.eup %886 }
0x1075   :  { %723 = vrot.lane.b32.xlu2 %v887_v26, %s897_s24 }
0x1076   :  { %v889_v28 = vpop.eup %888 }
0x1077   :  { %v704_v29 = vadd.f32 1.0, %v889_v28 }
0x1079   :  { %890 = vrcp.f32 %v704_v29  ;;  %v716_v40 = vand.u32 2147483648, %v704_v29  ;;  %vm710_vm15 = vweird.f32 %v704_v29  ;;  %v714_v41 = vand.u32 2147483647, %v704_v29 }
0x107b   :  { %v717_v3 = vor.u32 1.1754944e-38, %v716_v40  ;;  %vm715_vm2 = vcmp.eq.f32.partialorder %v714_v41, 8.507059e+37 }
0x107f   :  { %v891_v30 = vpop.eup %890 }
0x1080   :  { %v706_v34 = vmul.f32 %v891_v30, %v704_v29  ;;  %vm711_vm14 = vweird.f32 %v891_v30 }
0x1081   :  { %vm712_vm1 = vmor %vm710_vm15, %vm711_vm14 }
0x1082   :  { %v707_v35 = vsub.f32 1.0, %v706_v34 }
0x1084   :  { %v708_v37 = vmul.f32 %v891_v30, %v707_v35 }
0x1086   :  { %v709_v39 = vadd.f32 %v891_v30, %v708_v37 }
0x1088   :  { %v713_v2 = vsel %vm712_vm1, %v891_v30, %v709_v39 }
0x1089   :  { %v718_v1 = vsel %vm715_vm2, %v717_v3, %v713_v2 }
0x108a   :  { %v721_v43 = vmul.f32 %v718_v1, %v644_v16 }
0x10cf   :  { %v724_v42 = vpop.permute.xlu2 %723 }
0x10d0   :  { %v726_v0 = vmul.f32 %v724_v42, %v718_v1 }
0x10d2   :  { %728 = vrot.lane.b32.xlu0 %v726_v0, %s898_s25 }
0x1144   :  { %v729_v44 = vpop.permute.xlu0 %728 }
0x1145   :  { %v731_v45 = vadd.f32 %v729_v44, %v721_v43 }
0x1147   :  { %892 = vtanh.f32 %v731_v45  ;;  %768 = vrot.lane.b32.xlu0 %v731_v45, %s899_s0 }
0x114d   :  { %v893_v46 = vpop.eup %892 }
0x114e   :  { %734 = vrot.lane.b32.xlu1 %v893_v46, %s897_s24 }
0x11b9   :  { %v769_v47 = vpop.permute.xlu0 %768 }
0x11ba   :  { %771 = vst.msk [vmem:[#allocation4] sm:$0xff] %vm43_vm0, %v769_v47 }
0x11c0   :  { %v735_v48 = vpop.permute.xlu1 %734 }
0x11c1   :  { %v737_v49 = vmul.f32 %v735_v48, %v718_v1 }
0x11c3   :  { %739 = vrot.lane.b32.xlu2 %v737_v49, %s898_s25 }
0x121d   :  { %v740_v50 = vpop.permute.xlu2 %739 }
0x121e   :  { %766 = vst.msk [vmem:[#allocation3] sm:$0xff] %vm43_vm0, %v740_v50  ;;  %822 = vmatmul.msk.f32.vlgmr.msrb.gmra.mxu3 %vm43_vm0, %v740_v50 }
0x12a1   :  { %v760_v51 = vpop.f32.mrf.mxu3 }
0x12a2   :  { %v761_v52 = vadd.f32 %v1028_v38, %v760_v51 }
0x12a4   :  { %823 = vst [vmem:[%s1151_s4 + $0x38] sm:$0xff] %v761_v52 }
0x12a5   :  { %776 = vsyncmov [#allocation5] }
0x12a8   :  { %s777_s24 = vpop.sfrf %776 }
0x12a9   :  { %p824_p0 = scmp.ne.s32.totalorder %s777_s24, 0 }
0x12ab   :  { %781 = shalt.err (%p824_p0)  }

</bundles_post_ra>
